<compile_context>
chip_gen: v7x
topology: tpu7x:2x2x1
jax: 0.10.0
libtpu: 0.0.40
codegen_flags: <defaults>
</compile_context>

<pallas_src>
import jax
import jax.numpy as jnp
from jax import lax
from jax.experimental import pallas as pl
from jax.experimental.pallas import tpu as pltpu


def bigram_kernel(idx_ref, tgt_ref, emb_ref, logits_ref, perrow_ref):
    tn, v = logits_ref.shape

    idx = idx_ref[...]                                   # (TN, 1) int32
    tgt = tgt_ref[...]                                   # (TN, 1) int32
    col = lax.broadcasted_iota(jnp.int32, (tn, v), 1)    # (TN, V)

    # --- Embedding gather as one-hot matmul on the MXU. ---
    one_hot = jnp.where(col == idx, 1.0, 0.0).astype(emb_ref.dtype)   # (TN, V)
    logits_f32 = jnp.dot(one_hot, emb_ref[...],
                         preferred_element_type=jnp.float32)          # (TN, V)
    logits_ref[...] = logits_f32.astype(logits_ref.dtype)

    # --- Cross-entropy (per-row), numerically stable log-softmax in f32. ---
    m = jnp.max(logits_f32, axis=-1, keepdims=True)
    lse = m + jnp.log(jnp.sum(jnp.exp(logits_f32 - m), axis=-1, keepdims=True))
    tgt_logit = jnp.sum(jnp.where(col == tgt, logits_f32, 0.0),
                        axis=-1, keepdims=True)
    perrow_ref[...] = lse - tgt_logit                                 # (TN, 1)


def _round_up(x, m):
    return (x + m - 1) // m * m


def bigram_forward(idx, targets, emb_table, *, tile_rows=256):
    """idx, targets: (B, T) integer arrays.  emb_table: (V, V) float.

    Returns (logits of shape (B*T, V), scalar mean cross-entropy loss),
    matching the PyTorch module's return values when `targets` is given.
    """
    B, T = idx.shape
    V = emb_table.shape[0]
    N = B * T

    # Row-tile size: multiple of 8 sublanes, capped by (padded) N.
    TN = min(_round_up(tile_rows, 8), _round_up(N, 8))
    N_pad = _round_up(N, TN)
    G = N_pad // TN

    idx_flat = idx.reshape(-1).astype(jnp.int32)
    tgt_flat = targets.reshape(-1).astype(jnp.int32)
    if N_pad != N:
        # Pad with token 0 (a valid row); padded rows' losses are dropped in
        # the masked mean below.
        idx_flat = jnp.pad(idx_flat, (0, N_pad - N))
        tgt_flat = jnp.pad(tgt_flat, (0, N_pad - N))
    idx2d = idx_flat.reshape(N_pad, 1)
    tgt2d = tgt_flat.reshape(N_pad, 1)

    grid_spec = pltpu.PrefetchScalarGridSpec(
        num_scalar_prefetch=0,
        grid=(G,),
        in_specs=[
            pl.BlockSpec((TN, 1), lambda i: (i, 0)),      # idx tile
            pl.BlockSpec((TN, 1), lambda i: (i, 0)),      # targets tile
            pl.BlockSpec((V, V), lambda i: (0, 0)),       # emb table, VMEM-resident
        ],
        out_specs=[
            pl.BlockSpec((TN, V), lambda i: (i, 0)),      # logits (lane-dense)
            pl.BlockSpec((TN, 1), lambda i: (i, 0)),      # per-row loss
        ],
    )

    logits_pad, perrow = pl.pallas_call(
        bigram_kernel,
        out_shape=(
            jax.ShapeDtypeStruct((N_pad, V), emb_table.dtype),
            jax.ShapeDtypeStruct((N_pad, 1), jnp.float32),
        ),
        grid_spec=grid_spec,
        compiler_params=pltpu.CompilerParams(
            dimension_semantics=("parallel",)),
    )(idx2d, tgt2d, emb_table)

    logits = logits_pad[:N]
    loss = jnp.sum(perrow[:N, 0]) / jnp.float32(N)
    return logits, loss


if __name__ == "__main__":
    vocab_size = 128   # nn.Embedding(vocab_size, vocab_size)
    block_size = 8     # T (matches the module)
    batch_size = 32    # B (matches the module)

    key = jax.random.PRNGKey(0)
    k_emb, k_idx, k_tgt = jax.random.split(key, 3)

    # Deterministic parameter init (stand-in for nn.Embedding weight).
    emb_table = jax.random.normal(k_emb, (vocab_size, vocab_size), jnp.float32)
    idx = jax.random.randint(k_idx, (batch_size, block_size), 0, vocab_size, jnp.int32)
    targets = jax.random.randint(k_tgt, (batch_size, block_size), 0, vocab_size, jnp.int32)

    logits, loss = bigram_forward(idx, targets, emb_table)
    jax.block_until_ready((logits, loss))

    # Pure-JAX reference check.
    N = batch_size * block_size
    ref_logits = emb_table[idx.reshape(-1)]
    ref_lse = jax.nn.logsumexp(ref_logits, axis=-1)
    ref_loss = jnp.mean(
        ref_lse - ref_logits[jnp.arange(N), targets.reshape(-1)])
    assert jnp.allclose(logits, ref_logits, atol=1e-5), "logits mismatch"
    assert jnp.allclose(loss, ref_loss, atol=1e-5), "loss mismatch"

    print("KERNEL_OK")
</pallas_src>

<mosaic_0001>
module attributes {stable_mosaic.version = 11 : i64} {
  func.func @bigram_kernel(%arg0: i32, %arg1: memref<256x1xi32, #tpu.memory_space<vmem>>, %arg2: memref<256x1xi32, #tpu.memory_space<vmem>>, %arg3: memref<128x128xf32, #tpu.memory_space<vmem>>, %arg4: memref<256x128xf32, #tpu.memory_space<vmem>>, %arg5: memref<256x1xf32, #tpu.memory_space<vmem>>) attributes {dimension_semantics = [#tpu.dimension_semantics<parallel>], iteration_bounds = array<i64: 1>, scalar_prefetch = 0 : i64, scratch_operands = 0 : i64, tpu.core_type = #tpu.core_type<tc>, window_params = [{transform_indices = @transform_0, window_bounds = array<i64: 256, 1>}, {transform_indices = @transform_1, window_bounds = array<i64: 256, 1>}, {pipeline_mode = #tpu.pipeline_mode<synchronous>, transform_indices = @transform_2, window_bounds = array<i64: 128, 128>}, {transform_indices = @transform_3, window_bounds = array<i64: 256, 128>}, {transform_indices = @transform_4, window_bounds = array<i64: 256, 1>}]} {
    %c0 = arith.constant 0 : index
    %c0_0 = arith.constant 0 : index
    %0 = vector.load %arg1[%c0, %c0_0] : memref<256x1xi32, #tpu.memory_space<vmem>>, vector<256x1xi32>
    %c0_1 = arith.constant 0 : index
    %c0_2 = arith.constant 0 : index
    %1 = vector.load %arg2[%c0_1, %c0_2] : memref<256x1xi32, #tpu.memory_space<vmem>>, vector<256x1xi32>
    %2 = tpu.iota {dimensions = array<i32: 1>} : vector<256x128xi32>
    %3 = vector.broadcast %0 : vector<256x1xi32> to vector<256x128xi32>
    %4 = arith.cmpi eq, %2, %3 : vector<256x128xi32>
    %cst = arith.constant 1.000000e+00 : f32
    %cst_3 = arith.constant 0.000000e+00 : f32
    %5 = vector.broadcast %cst : f32 to vector<256x128xf32>
    %6 = vector.broadcast %cst_3 : f32 to vector<256x128xf32>
    %7 = arith.select %4, %5, %6 : vector<256x128xi1>, vector<256x128xf32>
    %c0_4 = arith.constant 0 : index
    %c0_5 = arith.constant 0 : index
    %8 = vector.load %arg3[%c0_4, %c0_5] : memref<128x128xf32, #tpu.memory_space<vmem>>, vector<128x128xf32>
    %cst_6 = arith.constant dense<0.000000e+00> : vector<256x128xf32>
    %9 = tpu.matmul %7, %8, %cst_6 {dimension_numbers = #tpu.dot_dimension_numbers<[1], [0], [0], [1], [0, 0, 1, 1], [], []>} : vector<256x128xf32>, vector<128x128xf32>, vector<256x128xf32> -> vector<256x128xf32>
    %c0_7 = arith.constant 0 : index
    %c0_8 = arith.constant 0 : index
    %10 = vector.load %arg4[%c0_7, %c0_8] : memref<256x128xf32, #tpu.memory_space<vmem>>, vector<256x128xf32>
    tpu.vector_store %arg4[%c0_7, %c0_8], %9 {strides = array<i32>} : memref<256x128xf32, #tpu.memory_space<vmem>>, vector<256x128xf32>,
    %cst_9 = arith.constant dense<0xFF800000> : vector<256xf32>
    %11 = vector.multi_reduction <maximumf>, %9, %cst_9 [1] : vector<256x128xf32> to vector<256xf32>
    %12 = vector.shape_cast %11 : vector<256xf32> to vector<256x1xf32>
    %13 = vector.broadcast %12 : vector<256x1xf32> to vector<256x128xf32>
    %14 = arith.subf %9, %13 : vector<256x128xf32>
    %15 = math.exp %14 : vector<256x128xf32>
    %cst_10 = arith.constant dense<0.000000e+00> : vector<256xf32>
    %16 = vector.multi_reduction <add>, %15, %cst_10 [1] : vector<256x128xf32> to vector<256xf32>
    %17 = vector.shape_cast %16 : vector<256xf32> to vector<256x1xf32>
    %18 = math.log %17 : vector<256x1xf32>
    %19 = arith.addf %12, %18 : vector<256x1xf32>
    %20 = vector.broadcast %1 : vector<256x1xi32> to vector<256x128xi32>
    %21 = arith.cmpi eq, %2, %20 : vector<256x128xi32>
    %cst_11 = arith.constant 0.000000e+00 : f32
    %22 = vector.broadcast %cst_11 : f32 to vector<256x128xf32>
    %23 = arith.select %21, %9, %22 : vector<256x128xi1>, vector<256x128xf32>
    %cst_12 = arith.constant dense<0.000000e+00> : vector<256xf32>
    %24 = vector.multi_reduction <add>, %23, %cst_12 [1] : vector<256x128xf32> to vector<256xf32>
    %25 = vector.shape_cast %24 : vector<256xf32> to vector<256x1xf32>
    %26 = arith.subf %19, %25 : vector<256x1xf32>
    %c0_13 = arith.constant 0 : index
    %c0_14 = arith.constant 0 : index
    %27 = vector.load %arg5[%c0_13, %c0_14] : memref<256x1xf32, #tpu.memory_space<vmem>>, vector<256x1xf32>
    tpu.vector_store %arg5[%c0_13, %c0_14], %26 {strides = array<i32>} : memref<256x1xf32, #tpu.memory_space<vmem>>, vector<256x1xf32>,
    return
  }
  func.func @transform_0(%arg0: i32) -> (i32, i32) {
    %c0_i32 = arith.constant 0 : i32
    %c0_i32_0 = arith.constant 0 : i32
    return %arg0, %c0_i32 : i32, i32
  }
  func.func @transform_1(%arg0: i32) -> (i32, i32) {
    %c0_i32 = arith.constant 0 : i32
    %c0_i32_0 = arith.constant 0 : i32
    return %arg0, %c0_i32 : i32, i32
  }
  func.func @transform_2(%arg0: i32) -> (i32, i32) {
    %c0_i32 = arith.constant 0 : i32
    %c0_i32_0 = arith.constant 0 : i32
    %c0_i32_1 = arith.constant 0 : i32
    return %c0_i32, %c0_i32_0 : i32, i32
  }
  func.func @transform_3(%arg0: i32) -> (i32, i32) {
    %c0_i32 = arith.constant 0 : i32
    %c0_i32_0 = arith.constant 0 : i32
    return %arg0, %c0_i32 : i32, i32
  }
  func.func @transform_4(%arg0: i32) -> (i32, i32) {
    %c0_i32 = arith.constant 0 : i32
    %c0_i32_0 = arith.constant 0 : i32
    return %arg0, %c0_i32 : i32, i32
  }
}

</mosaic_0001>

<bundles_post_ra>
// kernel: tpu_custom_call.1
= control target key start
LH: loop header
LB: loop body
LE: loop exit
PB: predicated region body
PF: predicated region fallthrough
CT: control target
= control target key end

     0   :  { %v1512_v2 = vmov 0   ;;  %s2469_s0 = inlined_call_operand.vmem [shape: s32[256,1], index: 0, kind: input, shape index: {}]   ;;  %s2470_s1 = inlined_call_operand.vmem [shape: s32[256,1], index: 1, kind: input, shape index: {}]   ;;  %s2471_s2 = inlined_call_operand.vmem [shape: f32[128,128], index: 2, kind: input, shape index: {}]   ;;  %s2472_s3 = inlined_call_operand.hbm [shape: f32[256,128], index: 3, kind: output, shape index: {0}]   ;;  %s2473_s4 = inlined_call_operand.vmem [shape: f32[256,1], index: 4, kind: output, shape index: {1}]  }
   0x1   :  { %v19_v0 = vld [vmem:[%s2469_s0 + $0x10] sm:$0xff]  ;;  %v17_v1 = vld [vmem:[%s2469_s0] sm:$0xff]  ;;  %1359 = vset.pattern.permute.xlu1 %v1512_v2  ;;  %1358 = vset.pattern.permute.xlu0 %v1512_v2  ;;  %v18_v4 = vld [vmem:[%s2469_s0 + $0x8] sm:$0xff] }
   0x2   :  { %90 = vperm.xlu1 %1359, %v19_v0   ;;  %84 = vperm.xlu0 %1358, %v17_v1   ;;  %v33_v3 = vld [vmem:[%s2469_s0 + $0x80] sm:$0xff]  ;;  %v35_v5 = vld [vmem:[%s2469_s0 + $0x90] sm:$0xff]  ;;  %v34_v6 = vld [vmem:[%s2469_s0 + $0x88] sm:$0xff] }
   0x3   :  { %v36_v7 = vld [vmem:[%s2469_s0 + $0x98] sm:$0xff]  ;;  %v37_v9 = vld [vmem:[%s2469_s0 + $0xa0] sm:$0xff]  ;;  %v244_v12 = vld [vmem:[%s2471_s2 + $0x8] sm:$0xff] }
   0x4   :  { %v20_v8 = vld [vmem:[%s2469_s0 + $0x18] sm:$0xff]  ;;  %v21_v10 = vld [vmem:[%s2469_s0 + $0x20] sm:$0xff]  ;;  %v245_v14 = vld [vmem:[%s2471_s2 + $0x10] sm:$0xff] }
   0x5   :  { %v243_v11 = vld [vmem:[%s2471_s2] sm:$0xff]  ;;  %v38_v15 = vld [vmem:[%s2469_s0 + $0xa8] sm:$0xff]  ;;  %v246_v17 = vld [vmem:[%s2471_s2 + $0x18] sm:$0xff] }
   0x6   :  { %132 = vperm.xlu1 %1359, %v33_v3   ;;  %87 = vperm.xlu0 %1358, %v18_v4   ;;  %v1305_v13 = vpack.c.bf16 %v244_v12, %v243_v11  ;;  %v22_v16 = vld [vmem:[%s2469_s0 + $0x28] sm:$0xff]  ;;  %v1309_v18 = vpack.c.bf16 %v246_v17, %v245_v14  ;;  %v247_v19 = vld [vmem:[%s2471_s2 + $0x20] sm:$0xff]  ;;  %v39_v21 = vld [vmem:[%s2469_s0 + $0xb0] sm:$0xff] }
   0x7   :  { %v248_v20 = vld [vmem:[%s2471_s2 + $0x28] sm:$0xff]  ;;  %v23_v22 = vld [vmem:[%s2469_s0 + $0x30] sm:$0xff]  ;;  %v250_v25 = vld [vmem:[%s2471_s2 + $0x38] sm:$0xff] }
   0x8   :  { %1306 = vmatprep.subr.bf16.mxu0 %v1305_v13  ;;  %1337 = vmatprep.subr.bf16.mxu1 %v1305_v13  ;;  %v1313_v23 = vpack.c.bf16 %v248_v20, %v247_v19  ;;  %v249_v24 = vld [vmem:[%s2471_s2 + $0x30] sm:$0xff] }
   0x9   :  { %1308 = vmatpush3.bf16.msra.mxu0 %v1305_v13  ;;  %1345 = vmatpush3.bf16.msra.mxu1 %v1305_v13 }
   0xa   :  { %138 = vperm.xlu1 %1359, %v35_v5   ;;  %135 = vperm.xlu0 %1358, %v34_v6  }
   0xb   :  { %1310 = vmatprep.subr.bf16.mxu0 %v1309_v18  ;;  %1338 = vmatprep.subr.bf16.mxu1 %v1309_v18 }
   0xd   :  { %1312 = vmatpush3.bf16.msra.mxu0 %v1309_v18  ;;  %1346 = vmatpush3.bf16.msra.mxu1 %v1309_v18 }
   0xe   :  { %141 = vperm.xlu1 %1359, %v36_v7   ;;  %93 = vperm.xlu0 %1358, %v20_v8  }
  0x12   :  { %144 = vperm.xlu1 %1359, %v37_v9   ;;  %96 = vperm.xlu0 %1358, %v21_v10  }
  0x16   :  { %147 = vperm.xlu1 %1359, %v38_v15   ;;  %99 = vperm.xlu0 %1358, %v22_v16  }
  0x1a   :  { %150 = vperm.xlu1 %1359, %v39_v21   ;;  %102 = vperm.xlu0 %1358, %v23_v22  }
  0x1b   :  { %10 = vsyncpa [#allocation3], 0  ;;  %v40_v26 = vld [vmem:[%s2469_s0 + $0xb8] sm:$0xff]  ;;  %1314 = vmatprep.subr.bf16.mxu0 %v1313_v23  ;;  %1339 = vmatprep.subr.bf16.mxu1 %v1313_v23  ;;  %v1317_v28 = vpack.c.bf16 %v250_v25, %v249_v24  ;;  %v251_v29 = vld [vmem:[%s2471_s2 + $0x40] sm:$0xff] }
  0x1c   :  { %v24_v27 = vld [vmem:[%s2469_s0 + $0x38] sm:$0xff]  ;;  %v252_v30 = vld [vmem:[%s2471_s2 + $0x48] sm:$0xff]  ;;  %1316 = vmatpush3.bf16.msra.mxu0 %v1313_v23  ;;  %1347 = vmatpush3.bf16.msra.mxu1 %v1313_v23  ;;  %v41_v31 = vld [vmem:[%s2469_s0 + $0xc0] sm:$0xff]  ;;  %v81_v23 = vlaneseq }
  0x1d   :  { %v25_v32 = vld [vmem:[%s2469_s0 + $0x40] sm:$0xff]  ;;  %1318 = vmatprep.subr.bf16.mxu0 %v1317_v28  ;;  %1340 = vmatprep.subr.bf16.mxu1 %v1317_v28  ;;  %v1321_v33 = vpack.c.bf16 %v252_v30, %v251_v29  ;;  %v253_v34 = vld [vmem:[%s2471_s2 + $0x50] sm:$0xff]  ;;  %v254_v35 = vld [vmem:[%s2471_s2 + $0x58] sm:$0xff]  ;;  %v1513_v29 = vmov 1.0  }
  0x1e   :  { %153 = vperm.xlu1 %1359, %v40_v26   ;;  %105 = vperm.xlu0 %1358, %v24_v27   ;;  %v42_v36 = vld [vmem:[%s2469_s0 + $0xc8] sm:$0xff]  ;;  %v1325_v38 = vpack.c.bf16 %v254_v35, %v253_v34  ;;  %v255_v39 = vld [vmem:[%s2471_s2 + $0x60] sm:$0xff]  ;;  %v43_v41 = vld [vmem:[%s2469_s0 + $0xd0] sm:$0xff]  ;;  %v1779_v25 = vand.u32 127, %v81_v23 }
  0x1f   :  { %v26_v37 = vld [vmem:[%s2469_s0 + $0x48] sm:$0xff]  ;;  %v27_v42 = vld [vmem:[%s2469_s0 + $0x50] sm:$0xff]  ;;  %v258_v45 = vld [vmem:[%s2471_s2 + $0x78] sm:$0xff] }
  0x20   :  { %1320 = vmatpush3.bf16.msra.mxu0 %v1317_v28  ;;  %1348 = vmatpush3.bf16.msra.mxu1 %v1317_v28  ;;  %v256_v40 = vld [vmem:[%s2471_s2 + $0x68] sm:$0xff]  ;;  %v257_v44 = vld [vmem:[%s2471_s2 + $0x70] sm:$0xff]  ;;  %v44_v46 = vld [vmem:[%s2469_s0 + $0xd8] sm:$0xff] }
  0x21   :  { %1322 = vmatprep.subr.bf16.mxu0 %v1321_v33  ;;  %1341 = vmatprep.subr.bf16.mxu1 %v1321_v33  ;;  %v1329_v43 = vpack.c.bf16 %v256_v40, %v255_v39  ;;  %v28_v47 = vld [vmem:[%s2469_s0 + $0x58] sm:$0xff]  ;;  %v1333_v48 = vpack.c.bf16 %v258_v45, %v257_v44  ;;  %v45_v49 = vld [vmem:[%s2469_s0 + $0xe0] sm:$0xff]  ;;  %v46_v51 = vld [vmem:[%s2469_s0 + $0xe8] sm:$0xff] }
  0x22   :  { %156 = vperm.xlu1 %1359, %v41_v31   ;;  %108 = vperm.xlu0 %1358, %v25_v32   ;;  %v29_v50 = vld [vmem:[%s2469_s0 + $0x60] sm:$0xff]  ;;  %v30_v52 = vld [vmem:[%s2469_s0 + $0x68] sm:$0xff]  ;;  %v47_v53 = vld [vmem:[%s2469_s0 + $0xf0] sm:$0xff] }
  0x23   :  { %v31_v54 = vld [vmem:[%s2469_s0 + $0x70] sm:$0xff]  ;;  %v48_v55 = vld [vmem:[%s2469_s0 + $0xf8] sm:$0xff]  ;;  %v49_v57 = vld [vmem:[%s2470_s1] sm:$0xff] }
  0x24   :  { %1324 = vmatpush3.bf16.msra.mxu0 %v1321_v33  ;;  %1349 = vmatpush3.bf16.msra.mxu1 %v1321_v33  ;;  %v32_v56 = vld [vmem:[%s2469_s0 + $0x78] sm:$0xff]  ;;  %v50_v58 = vld [vmem:[%s2470_s1 + $0x8] sm:$0xff]  ;;  %v51_v59 = vld [vmem:[%s2470_s1 + $0x10] sm:$0xff] }
  0x25   :  { %1326 = vmatprep.subr.bf16.mxu0 %v1325_v38  ;;  %1342 = vmatprep.subr.bf16.mxu1 %v1325_v38  ;;  %v53_v60 = vld [vmem:[%s2470_s1 + $0x20] sm:$0xff]  ;;  %v52_v61 = vld [vmem:[%s2470_s1 + $0x18] sm:$0xff]  ;;  %v55_v62 = vld [vmem:[%s2470_s1 + $0x30] sm:$0xff] }
  0x26   :  { %159 = vperm.xlu1 %1359, %v42_v36   ;;  %111 = vperm.xlu0 %1358, %v26_v37   ;;  %v54_v63 = vld [vmem:[%s2470_s1 + $0x28] sm:$0xff]  ;;  %v57_v0 = vld [vmem:[%s2470_s1 + $0x40] sm:$0xff]  ;;  %v56_v1 = vld [vmem:[%s2470_s1 + $0x38] sm:$0xff] }
  0x27   :  { %v59_v2 = vld [vmem:[%s2470_s1 + $0x50] sm:$0xff]  ;;  %v58_v3 = vld [vmem:[%s2470_s1 + $0x48] sm:$0xff]  ;;  %v61_v4 = vld [vmem:[%s2470_s1 + $0x60] sm:$0xff] }
  0x28   :  { %1328 = vmatpush3.bf16.msra.mxu0 %v1325_v38  ;;  %1350 = vmatpush3.bf16.msra.mxu1 %v1325_v38  ;;  %v60_v5 = vld [vmem:[%s2470_s1 + $0x58] sm:$0xff]  ;;  %v63_v6 = vld [vmem:[%s2470_s1 + $0x70] sm:$0xff]  ;;  %v62_v7 = vld [vmem:[%s2470_s1 + $0x68] sm:$0xff] }
  0x29   :  { %1330 = vmatprep.subr.bf16.mxu0 %v1329_v43  ;;  %1343 = vmatprep.subr.bf16.mxu1 %v1329_v43  ;;  %v65_v8 = vld [vmem:[%s2470_s1 + $0x80] sm:$0xff]  ;;  %v64_v9 = vld [vmem:[%s2470_s1 + $0x78] sm:$0xff]  ;;  %v67_v10 = vld [vmem:[%s2470_s1 + $0x90] sm:$0xff] }
  0x2a   :  { %162 = vperm.xlu1 %1359, %v43_v41   ;;  %114 = vperm.xlu0 %1358, %v27_v42   ;;  %v66_v11 = vld [vmem:[%s2470_s1 + $0x88] sm:$0xff]  ;;  %v69_v12 = vld [vmem:[%s2470_s1 + $0xa0] sm:$0xff]  ;;  %v68_v13 = vld [vmem:[%s2470_s1 + $0x98] sm:$0xff] }
  0x2b   :  { %v71_v14 = vld [vmem:[%s2470_s1 + $0xb0] sm:$0xff]  ;;  %v70_v15 = vld [vmem:[%s2470_s1 + $0xa8] sm:$0xff]  ;;  %v73_v16 = vld [vmem:[%s2470_s1 + $0xc0] sm:$0xff] }
  0x2c   :  { %1332 = vmatpush3.bf16.msra.mxu0 %v1329_v43  ;;  %1351 = vmatpush3.bf16.msra.mxu1 %v1329_v43  ;;  %v72_v17 = vld [vmem:[%s2470_s1 + $0xb8] sm:$0xff]  ;;  %v75_v18 = vld [vmem:[%s2470_s1 + $0xd0] sm:$0xff]  ;;  %v74_v19 = vld [vmem:[%s2470_s1 + $0xc8] sm:$0xff] }
  0x2d   :  { %1334 = vmatprep.subr.bf16.mxu0 %v1333_v48  ;;  %1344 = vmatprep.subr.bf16.mxu1 %v1333_v48  ;;  %v77_v20 = vld [vmem:[%s2470_s1 + $0xe0] sm:$0xff]  ;;  %v76_v21 = vld [vmem:[%s2470_s1 + $0xd8] sm:$0xff]  ;;  %v79_v22 = vld [vmem:[%s2470_s1 + $0xf0] sm:$0xff] }
  0x2e   :  { %165 = vperm.xlu1 %1359, %v44_v46   ;;  %117 = vperm.xlu0 %1358, %v28_v47   ;;  %v78_v24 = vld [vmem:[%s2470_s1 + $0xe8] sm:$0xff]  ;;  %v80_v26 = vld [vmem:[%s2470_s1 + $0xf8] sm:$0xff]  ;;  %s1514_s1 = smov [#allocation2]  }
  0x2f   :  { %s1130_s0 = sshll.u32 %s1514_s1, 4  ;;  %s1131_s0 = int_to_ptr.vmem [resolvable:$true] %s1130_s0 }
  0x30   :  { %1336 = vmatpush3.bf16.msra.mxu0 %v1333_v48  ;;  %1352 = vmatpush3.bf16.msra.mxu1 %v1333_v48  ;;  %s1488_s14 = scalar_lea.vmem %s1131_s0, 4096  ;;  %p1493_p1 = scmp.lt.s32.totalorder %s1131_s0, %s1131_s0 }
  0x31   :  { %p1489_p0 = scmp.ne.s32.totalorder %s1131_s0, %s1488_s14  ;;  %p1494_p2 = scmp.lt.s32.totalorder %s1488_s14, %s1488_s14 }
  0x32   :  { %168 = vperm.xlu1 %1359, %v45_v49   ;;  %120 = vperm.xlu0 %1358, %v29_v50  }
  0x33   :  { %p1495_p3 = por %p1494_p2, %p1493_p1 }
  0x35   :  { %p1496_p4 = pnand %p1495_p3, %p1489_p0 }
  0x36   :  { %171 = vperm.xlu1 %1359, %v46_v51   ;;  %123 = vperm.xlu0 %1358, %v30_v52  }
  0x3a   :  { %174 = vperm.xlu1 %1359, %v47_v53   ;;  %126 = vperm.xlu0 %1358, %v31_v54  }
  0x3e   :  { %177 = vperm.xlu1 %1359, %v48_v55   ;;  %129 = vperm.xlu0 %1358, %v32_v56  }
  0x42   :  { %837 = vperm.xlu1 %1359, %v49_v57   ;;  %840 = vperm.xlu0 %1358, %v50_v58  }
  0x46   :  { %843 = vperm.xlu1 %1359, %v51_v59   ;;  %849 = vperm.xlu0 %1358, %v53_v60  }
  0x4a   :  { %846 = vperm.xlu1 %1359, %v52_v61   ;;  %855 = vperm.xlu0 %1358, %v55_v62  }
  0x4e   :  { %852 = vperm.xlu1 %1359, %v54_v63   ;;  %861 = vperm.xlu0 %1358, %v57_v0  }
  0x52   :  { %858 = vperm.xlu1 %1359, %v56_v1   ;;  %867 = vperm.xlu0 %1358, %v59_v2  }
  0x56   :  { %864 = vperm.xlu1 %1359, %v58_v3   ;;  %873 = vperm.xlu0 %1358, %v61_v4  }
  0x5a   :  { %870 = vperm.xlu1 %1359, %v60_v5   ;;  %879 = vperm.xlu0 %1358, %v63_v6  }
  0x5e   :  { %876 = vperm.xlu1 %1359, %v62_v7   ;;  %885 = vperm.xlu0 %1358, %v65_v8  }
  0x62   :  { %882 = vperm.xlu1 %1359, %v64_v9   ;;  %891 = vperm.xlu0 %1358, %v67_v10  }
  0x66   :  { %888 = vperm.xlu1 %1359, %v66_v11   ;;  %897 = vperm.xlu0 %1358, %v69_v12  }
  0x6a   :  { %894 = vperm.xlu1 %1359, %v68_v13   ;;  %903 = vperm.xlu0 %1358, %v71_v14  }
  0x6e   :  { %900 = vperm.xlu1 %1359, %v70_v15   ;;  %909 = vperm.xlu0 %1358, %v73_v16  }
  0x72   :  { %906 = vperm.xlu1 %1359, %v72_v17   ;;  %915 = vperm.xlu0 %1358, %v75_v18  }
  0x76   :  { %912 = vperm.xlu1 %1359, %v74_v19   ;;  %921 = vperm.xlu0 %1358, %v77_v20  }
  0x7a   :  { %918 = vperm.xlu1 %1359, %v76_v21   ;;  %927 = vperm.xlu0 %1358, %v79_v22  }
  0x7e   :  { %924 = vperm.xlu1 %1359, %v78_v24  }
  0x81   :  { %v91_v27 = vpop.permute.xlu1 %90  ;;  %v85_v28 = vpop.permute.xlu0 %84 }
  0x82   :  { %930 = vperm.xlu1 %1359, %v80_v26   ;;  %vm179_vm0 = vcmp.eq.s32.totalorder %v1779_v25, %v85_v28  ;;  %vm181_vm3 = vcmp.eq.s32.totalorder %v1779_v25, %v91_v27 }
  0x83   :  { %1257 = vmatprep.mubr.msk.f32.mxu0 %vm179_vm0, %v1513_v29 }
  0x85   :  { %v133_v30 = vpop.permute.xlu1 %132  ;;  %v88_v31 = vpop.permute.xlu0 %87 }
  0x86   :  { %vm180_vm1 = vcmp.eq.s32.totalorder %v1779_v25, %v88_v31  ;;  %vm195_vm2 = vcmp.eq.s32.totalorder %v1779_v25, %v133_v30 }
  0x87   :  { %1258 = vmatmul.mubr.msk.f32.vlgmr.msra.gmra.mrb[0].mxu0 %vm180_vm1, %v1513_v29  ;;  %1281 = vmatprep.mubr.msk.f32.mxu1 %vm195_vm2, %v1513_v29 }
  0x88   :  { %1260 = vmatprep.mubr.msk.f32.mxu0 %vm181_vm3, %v1513_v29 }
  0x89   :  { %v139_v32 = vpop.permute.xlu1 %138  ;;  %v136_v33 = vpop.permute.xlu0 %135 }
  0x8a   :  { %vm197_vm4 = vcmp.eq.s32.totalorder %v1779_v25, %v139_v32  ;;  %vm196_vm5 = vcmp.eq.s32.totalorder %v1779_v25, %v136_v33 }
  0x8b   :  { %1282 = vmatmul.mubr.msk.f32.vlgmr.msra.gmra.mrb[0].mxu1 %vm196_vm5, %v1513_v29 }
  0x8c   :  { %1284 = vmatprep.mubr.msk.f32.mxu1 %vm197_vm4, %v1513_v29 }
  0x8d   :  { %v142_v34 = vpop.permute.xlu1 %141  ;;  %v94_v35 = vpop.permute.xlu0 %93 }
  0x8e   :  { %vm198_vm6 = vcmp.eq.s32.totalorder %v1779_v25, %v142_v34  ;;  %vm182_vm7 = vcmp.eq.s32.totalorder %v1779_v25, %v94_v35 }
  0x8f   :  { %1261 = vmatmul.mubr.msk.f32.gmra.mrb[2].mxu0 %vm182_vm7, %v1513_v29  ;;  %1285 = vmatmul.mubr.msk.f32.gmra.mrb[2].mxu1 %vm198_vm6, %v1513_v29 }
  0x91   :  { %v145_v36 = vpop.permute.xlu1 %144  ;;  %v97_v37 = vpop.permute.xlu0 %96 }
  0x92   :  { %vm199_vm8 = vcmp.eq.s32.totalorder %v1779_v25, %v145_v36  ;;  %vm183_vm9 = vcmp.eq.s32.totalorder %v1779_v25, %v97_v37 }
  0x93   :  { %1263 = vmatprep.mubr.msk.f32.mxu0 %vm183_vm9, %v1513_v29  ;;  %1287 = vmatprep.mubr.msk.f32.mxu1 %vm199_vm8, %v1513_v29 }
  0x95   :  { %v148_v38 = vpop.permute.xlu1 %147  ;;  %v100_v39 = vpop.permute.xlu0 %99 }
  0x96   :  { %vm200_vm10 = vcmp.eq.s32.totalorder %v1779_v25, %v148_v38  ;;  %vm184_vm11 = vcmp.eq.s32.totalorder %v1779_v25, %v100_v39 }
  0x97   :  { %1264 = vmatmul.mubr.msk.f32.gmra.mrb[4].mxu0 %vm184_vm11, %v1513_v29  ;;  %1288 = vmatmul.mubr.msk.f32.gmra.mrb[4].mxu1 %vm200_vm10, %v1513_v29 }
  0x99   :  { %v151_v40 = vpop.permute.xlu1 %150  ;;  %v103_v41 = vpop.permute.xlu0 %102 }
  0x9a   :  { %vm201_vm12 = vcmp.eq.s32.totalorder %v1779_v25, %v151_v40  ;;  %vm185_vm13 = vcmp.eq.s32.totalorder %v1779_v25, %v103_v41 }
  0x9b   :  { %1266 = vmatprep.mubr.msk.f32.mxu0 %vm185_vm13, %v1513_v29  ;;  %1290 = vmatprep.mubr.msk.f32.mxu1 %vm201_vm12, %v1513_v29 }
  0x9d   :  { %v154_v42 = vpop.permute.xlu1 %153  ;;  %v106_v43 = vpop.permute.xlu0 %105 }
  0x9e   :  { %vm202_vm14 = vcmp.eq.s32.totalorder %v1779_v25, %v154_v42  ;;  %vm186_vm15 = vcmp.eq.s32.totalorder %v1779_v25, %v106_v43 }
  0x9f   :  { %1267 = vmatmul.mubr.msk.f32.gmra.mrb[6].mxu0 %vm186_vm15, %v1513_v29  ;;  %1291 = vmatmul.mubr.msk.f32.gmra.mrb[6].mxu1 %vm202_vm14, %v1513_v29 }
  0xa1   :  { %v157_v44 = vpop.permute.xlu1 %156  ;;  %v109_v45 = vpop.permute.xlu0 %108 }
  0xa2   :  { %vm203_vm0 = vcmp.eq.s32.totalorder %v1779_v25, %v157_v44  ;;  %vm187_vm1 = vcmp.eq.s32.totalorder %v1779_v25, %v109_v45 }
  0xa3   :  { %1269 = vmatprep.mubr.msk.f32.mxu0 %vm187_vm1, %v1513_v29  ;;  %1293 = vmatprep.mubr.msk.f32.mxu1 %vm203_vm0, %v1513_v29 }
  0xa5   :  { %v160_v46 = vpop.permute.xlu1 %159  ;;  %v112_v47 = vpop.permute.xlu0 %111 }
  0xa6   :  { %vm204_vm2 = vcmp.eq.s32.totalorder %v1779_v25, %v160_v46  ;;  %vm188_vm3 = vcmp.eq.s32.totalorder %v1779_v25, %v112_v47 }
  0xa7   :  { %1270 = vmatmul.mubr.msk.f32.gmra.mrb[8].mxu0 %vm188_vm3, %v1513_v29  ;;  %1294 = vmatmul.mubr.msk.f32.gmra.mrb[8].mxu1 %vm204_vm2, %v1513_v29 }
  0xa9   :  { %v163_v48 = vpop.permute.xlu1 %162  ;;  %v115_v49 = vpop.permute.xlu0 %114 }
  0xaa   :  { %vm205_vm4 = vcmp.eq.s32.totalorder %v1779_v25, %v163_v48  ;;  %vm189_vm5 = vcmp.eq.s32.totalorder %v1779_v25, %v115_v49 }
  0xab   :  { %1272 = vmatprep.mubr.msk.f32.mxu0 %vm189_vm5, %v1513_v29  ;;  %1296 = vmatprep.mubr.msk.f32.mxu1 %vm205_vm4, %v1513_v29 }
  0xad   :  { %v166_v50 = vpop.permute.xlu1 %165  ;;  %v118_v51 = vpop.permute.xlu0 %117 }
  0xae   :  { %vm206_vm6 = vcmp.eq.s32.totalorder %v1779_v25, %v166_v50  ;;  %vm190_vm7 = vcmp.eq.s32.totalorder %v1779_v25, %v118_v51 }
  0xaf   :  { %1273 = vmatmul.mubr.msk.f32.gmra.mrb[10].mxu0 %vm190_vm7, %v1513_v29  ;;  %1297 = vmatmul.mubr.msk.f32.gmra.mrb[10].mxu1 %vm206_vm6, %v1513_v29 }
  0xb1   :  { %v169_v52 = vpop.permute.xlu1 %168  ;;  %v121_v53 = vpop.permute.xlu0 %120 }
  0xb2   :  { %vm207_vm8 = vcmp.eq.s32.totalorder %v1779_v25, %v169_v52  ;;  %vm191_vm9 = vcmp.eq.s32.totalorder %v1779_v25, %v121_v53 }
  0xb3   :  { %1275 = vmatprep.mubr.msk.f32.mxu0 %vm191_vm9, %v1513_v29  ;;  %1299 = vmatprep.mubr.msk.f32.mxu1 %vm207_vm8, %v1513_v29 }
  0xb5   :  { %v172_v54 = vpop.permute.xlu1 %171  ;;  %v124_v55 = vpop.permute.xlu0 %123 }
  0xb6   :  { %vm208_vm10 = vcmp.eq.s32.totalorder %v1779_v25, %v172_v54  ;;  %vm192_vm11 = vcmp.eq.s32.totalorder %v1779_v25, %v124_v55 }
  0xb7   :  { %1276 = vmatmul.mubr.msk.f32.gmra.mrb[12].mxu0 %vm192_vm11, %v1513_v29  ;;  %1300 = vmatmul.mubr.msk.f32.gmra.mrb[12].mxu1 %vm208_vm10, %v1513_v29 }
  0xb9   :  { %v175_v56 = vpop.permute.xlu1 %174  ;;  %v127_v57 = vpop.permute.xlu0 %126 }
  0xba   :  { %vm209_vm12 = vcmp.eq.s32.totalorder %v1779_v25, %v175_v56  ;;  %vm193_vm13 = vcmp.eq.s32.totalorder %v1779_v25, %v127_v57 }
  0xbb   :  { %1278 = vmatprep.mubr.msk.f32.mxu0 %vm193_vm13, %v1513_v29  ;;  %1302 = vmatprep.mubr.msk.f32.mxu1 %vm209_vm12, %v1513_v29 }
  0xbd   :  { %v178_v58 = vpop.permute.xlu1 %177  ;;  %v130_v59 = vpop.permute.xlu0 %129 }
  0xbe   :  { %vm210_vm14 = vcmp.eq.s32.totalorder %v1779_v25, %v178_v58  ;;  %vm194_vm15 = vcmp.eq.s32.totalorder %v1779_v25, %v130_v59 }
  0xbf   :  { %1279 = vmatmul.mubr.msk.f32.gmra.mrb[14].mxu0 %vm194_vm15, %v1513_v29  ;;  %1303 = vmatmul.mubr.msk.f32.gmra.mrb[14].mxu1 %vm210_vm14, %v1513_v29 }
  0xc1   :  { %v838_v60 = vpop.permute.xlu1 %837  ;;  %v841_v9 = vpop.permute.xlu0 %840 }
  0xc2   :  { %vm933_vm0 = vcmp.eq.s32.totalorder %v1779_v25, %v841_v9  ;;  %vm932_vm1 = vcmp.eq.s32.totalorder %v1779_v25, %v838_v60 }
  0xc5   :  { %v1848_v61 = vpop.permute.xlu1 %843  ;;  %v850_v23 = vpop.permute.xlu0 %849 }
  0xc6   :  { %vm936_vm2 = vcmp.eq.s32.totalorder %v1779_v25, %v850_v23  ;;  %vm934_vm4 = vcmp.eq.s32.totalorder %v1779_v25, %v1848_v61 }
  0xc9   :  { %v1850_v62 = vpop.permute.xlu1 %846  ;;  %v856_v32 = vpop.permute.xlu0 %855 }
  0xca   :  { %vm935_vm3 = vcmp.eq.s32.totalorder %v1779_v25, %v1850_v62  ;;  %vm938_vm5 = vcmp.eq.s32.totalorder %v1779_v25, %v856_v32 }
  0xcd   :  { %v1852_v63 = vpop.permute.xlu1 %852  ;;  %v862_v47 = vpop.permute.xlu0 %861 }
  0xce   :  { %vm937_vm7 = vcmp.eq.s32.totalorder %v1779_v25, %v1852_v63  ;;  %vm940_vm9 = vcmp.eq.s32.totalorder %v1779_v25, %v862_v47 }
  0xd1   :  { %v1854_v0 = vpop.permute.xlu1 %858  ;;  %v868_v55 = vpop.permute.xlu0 %867 }
  0xd2   :  { %vm939_vm10 = vcmp.eq.s32.totalorder %v1779_v25, %v1854_v0  ;;  %vm942_vm11 = vcmp.eq.s32.totalorder %v1779_v25, %v868_v55 }
  0xd5   :  { %v1856_v1 = vpop.permute.xlu1 %864  ;;  %v874_v62 = vpop.permute.xlu0 %873 }
  0xd6   :  { %vm941_vm12 = vcmp.eq.s32.totalorder %v1779_v25, %v1856_v1  ;;  %vm944_vm14 = vcmp.eq.s32.totalorder %v1779_v25, %v874_v62 }
  0xd9   :  { %v1858_v2 = vpop.permute.xlu1 %870  ;;  %v880_v0 = vpop.permute.xlu0 %879 }
  0xda   :  { %vm943_vm13 = vcmp.eq.s32.totalorder %v1779_v25, %v1858_v2 }
  0xdd   :  { %v1860_v3 = vpop.permute.xlu1 %876  ;;  %v886_v9 = vpop.permute.xlu0 %885 }
  0xde   :  { %vm948_vm15 = vcmp.eq.s32.totalorder %v1779_v25, %v886_v9 }
  0xe1   :  { %v1862_v4 = vpop.permute.xlu1 %882 }
  0xe5   :  { %v1866_v6 = vpop.permute.xlu1 %888 }
  0xe9   :  { %v1881_v11 = vpop.permute.xlu1 %894 }
  0xed   :  { %v1901_v18 = vpop.permute.xlu1 %900 }
  0xf1   :  { %v1919_v24 = vpop.permute.xlu1 %906 }
  0xf5   :  { %v1940_v33 = vpop.permute.xlu1 %912 }
  0xf9   :  { %v919_v39 = vpop.permute.xlu1 %918 }
  0xfa   :  { %vm959_vm6 = vcmp.eq.s32.totalorder %v1779_v25, %v919_v39 }
  0xfd   :  { %v925_v48 = vpop.permute.xlu1 %924 }
  0xfe   :  { %vm961_vm8 = vcmp.eq.s32.totalorder %v1779_v25, %v925_v48 }
 0x101   :  { %v2076_v55 = vpop.permute.xlu1 %930 }
 0x15a   :  { %v1864_v5 = vpop.f32.mrb[0].mxu0 }
 0x15b   :  { %485 = vst [vmem:[#allocation2 + $0x8] sm:$0xff] %v1864_v5  ;;  %518 = vmax.xlane.f32.xlu1 %v1864_v5  ;;  %v1870_v7 = vpop.f32.mrb[1].mxu0  ;;  %v965_v16 = vsel %vm933_vm0, %v1864_v5, 0.0 }
 0x15c   :  { %484 = vst [vmem:[#allocation2] sm:$0xff] %v1870_v7  ;;  %v964_v17 = vsel %vm932_vm1, %v1870_v7, 0.0 }
 0x15e   :  { %v1873_v8 = vpop.f32.mrb[0].mxu1 }
 0x15f   :  { %501 = vst [vmem:[#allocation2 + $0x88] sm:$0xff] %v1873_v8  ;;  %550 = vmax.xlane.f32.xlu0 %v1873_v8  ;;  %v1877_v10 = vpop.f32.mrb[1].mxu1 }
 0x160   :  { %500 = vst [vmem:[#allocation2 + $0x80] sm:$0xff] %v1877_v10  ;;  %548 = vmax.xlane.f32.xlu1 %v1877_v10  ;;  %v980_v23 = vsel %vm948_vm15, %v1877_v10, 0.0  ;;  %vm963_vm15 = vcmp.eq.s32.totalorder %v1779_v25, %v2076_v55 }
 0x162   :  { %v1883_v12 = vpop.f32.mrb[2].mxu0  ;;  %v1885_v13 = vpop.f32.mrb[2].mxu1 }
 0x163   :  { %487 = vst [vmem:[#allocation2 + $0x18] sm:$0xff] %v1883_v12  ;;  %503 = vst [vmem:[#allocation2 + $0x98] sm:$0xff] %v1885_v13  ;;  %516 = vmax.xlane.f32.xlu0 %v1870_v7  ;;  %v1891_v14 = vpop.f32.mrb[3].mxu0  ;;  %v1893_v15 = vpop.f32.mrb[3].mxu1  ;;  %v967_v31 = vsel %vm935_vm3, %v1883_v12, 0.0  ;;  %vm945_vm3 = vcmp.eq.s32.totalorder %v1779_v25, %v1860_v3 }
 0x164   :  { %486 = vst [vmem:[#allocation2 + $0x10] sm:$0xff] %v1891_v14  ;;  %502 = vst [vmem:[#allocation2 + $0x90] sm:$0xff] %v1893_v15  ;;  %998 = vadd.xlane.f32.xlu1 %v965_v16  ;;  %v966_v36 = vsel %vm934_vm4, %v1891_v14, 0.0  ;;  %v892_v16 = vpop.permute.xlu0 %891  ;;  %vm946_vm4 = vcmp.eq.s32.totalorder %v1779_v25, %v880_v0 }
 0x165   :  { %vm950_vm0 = vcmp.eq.s32.totalorder %v1779_v25, %v892_v16 }
 0x166   :  { %v982_v2 = vsel %vm950_vm0, %v1893_v15, 0.0 }
 0x167   :  { %996 = vadd.xlane.f32.xlu0 %v964_v17 }
 0x168   :  { %552 = vmax.xlane.f32.xlu1 %v1893_v15 }
 0x16a   :  { %v1903_v19 = vpop.f32.mrb[4].mxu0  ;;  %v1905_v20 = vpop.f32.mrb[4].mxu1 }
 0x16b   :  { %489 = vst [vmem:[#allocation2 + $0x28] sm:$0xff] %v1903_v19  ;;  %505 = vst [vmem:[#allocation2 + $0xa8] sm:$0xff] %v1905_v20  ;;  %v1909_v21 = vpop.f32.mrb[5].mxu1  ;;  %522 = vmax.xlane.f32.xlu0 %v1883_v12  ;;  %v1912_v22 = vpop.f32.mrb[5].mxu0  ;;  %v969_v46 = vsel %vm937_vm7, %v1903_v19, 0.0  ;;  %vm953_vm7 = vcmp.eq.s32.totalorder %v1779_v25, %v1901_v18 }
 0x16c   :  { %504 = vst [vmem:[#allocation2 + $0xa0] sm:$0xff] %v1909_v21  ;;  %488 = vst [vmem:[#allocation2 + $0x20] sm:$0xff] %v1912_v22  ;;  %524 = vmax.xlane.f32.xlu1 %v1912_v22  ;;  %v968_v30 = vsel %vm936_vm2, %v1912_v22, 0.0  ;;  %v985_v3 = vsel %vm953_vm7, %v1905_v20, 0.0 }
 0x16f   :  { %554 = vmax.xlane.f32.xlu0 %v1885_v13 }
 0x170   :  { %556 = vmax.xlane.f32.xlu1 %v1909_v21 }
 0x172   :  { %v1921_v26 = vpop.f32.mrb[6].mxu0  ;;  %v1923_v27 = vpop.f32.mrb[6].mxu1 }
 0x173   :  { %491 = vst [vmem:[#allocation2 + $0x38] sm:$0xff] %v1921_v26  ;;  %507 = vst [vmem:[#allocation2 + $0xb8] sm:$0xff] %v1923_v27  ;;  %v1928_v28 = vpop.f32.mrb[7].mxu1  ;;  %520 = vmax.xlane.f32.xlu0 %v1891_v14  ;;  %v1931_v29 = vpop.f32.mrb[7].mxu0  ;;  %v971_v58 = vsel %vm939_vm10, %v1921_v26, 0.0 }
 0x174   :  { %506 = vst [vmem:[#allocation2 + $0xb0] sm:$0xff] %v1928_v28  ;;  %490 = vst [vmem:[#allocation2 + $0x30] sm:$0xff] %v1931_v29  ;;  %1004 = vadd.xlane.f32.xlu1 %v968_v30  ;;  %v970_v40 = vsel %vm938_vm5, %v1931_v29, 0.0  ;;  %v898_v30 = vpop.permute.xlu0 %897  ;;  %vm949_vm5 = vcmp.eq.s32.totalorder %v1779_v25, %v1866_v6 }
 0x175   :  { %vm952_vm1 = vcmp.eq.s32.totalorder %v1779_v25, %v898_v30 }
 0x176   :  { %v984_v32 = vsel %vm952_vm1, %v1909_v21, 0.0 }
 0x177   :  { %1002 = vadd.xlane.f32.xlu0 %v967_v31 }
 0x178   :  { %528 = vmax.xlane.f32.xlu1 %v1931_v29  ;;  %v904_v31 = vpop.permute.xlu0 %903 }
 0x179   :  { %vm954_vm2 = vcmp.eq.s32.totalorder %v1779_v25, %v904_v31 }
 0x17a   :  { %v1944_v34 = vpop.f32.mrb[8].mxu0  ;;  %v1946_v35 = vpop.f32.mrb[8].mxu1 }
 0x17b   :  { %493 = vst [vmem:[#allocation2 + $0x48] sm:$0xff] %v1944_v34  ;;  %509 = vst [vmem:[#allocation2 + $0xc8] sm:$0xff] %v1946_v35  ;;  %v1951_v37 = vpop.f32.mrb[9].mxu1  ;;  %1000 = vadd.xlane.f32.xlu0 %v966_v36  ;;  %v1953_v38 = vpop.f32.mrb[9].mxu0  ;;  %v973_v63 = vsel %vm941_vm12, %v1944_v34, 0.0  ;;  %v986_v36 = vsel %vm954_vm2, %v1928_v28, 0.0 }
 0x17c   :  { %508 = vst [vmem:[#allocation2 + $0xc0] sm:$0xff] %v1951_v37  ;;  %492 = vst [vmem:[#allocation2 + $0x40] sm:$0xff] %v1953_v38  ;;  %560 = vmax.xlane.f32.xlu1 %v1928_v28  ;;  %v972_v53 = vsel %vm940_vm9, %v1953_v38, 0.0  ;;  %vm947_vm9 = vcmp.eq.s32.totalorder %v1779_v25, %v1862_v4  ;;  %v2070_v48 = vpop.permute.xlu0 %909 }
 0x17d   :  { %vm956_vm10 = vcmp.eq.s32.totalorder %v1779_v25, %v2070_v48 }
 0x17f   :  { %526 = vmax.xlane.f32.xlu0 %v1903_v19 }
 0x180   :  { %1008 = vadd.xlane.f32.xlu1 %v970_v40 }
 0x182   :  { %v1962_v41 = vpop.f32.mrb[10].mxu0  ;;  %v1964_v42 = vpop.f32.mrb[10].mxu1 }
 0x183   :  { %495 = vst [vmem:[#allocation2 + $0x58] sm:$0xff] %v1962_v41  ;;  %511 = vst [vmem:[#allocation2 + $0xd8] sm:$0xff] %v1964_v42  ;;  %v1968_v43 = vpop.f32.mrb[11].mxu1  ;;  %558 = vmax.xlane.f32.xlu0 %v1905_v20  ;;  %v1971_v44 = vpop.f32.mrb[11].mxu0  ;;  %v1974_v45 = vsel %vm959_vm6, %v1964_v42, 0.0  ;;  %v975_v1 = vsel %vm943_vm13, %v1962_v41, 0.0  ;;  %vm951_vm6 = vcmp.eq.s32.totalorder %v1779_v25, %v1881_v11 }
 0x184   :  { %510 = vst [vmem:[#allocation2 + $0xd0] sm:$0xff] %v1968_v43  ;;  %494 = vst [vmem:[#allocation2 + $0x50] sm:$0xff] %v1971_v44  ;;  %532 = vmax.xlane.f32.xlu1 %v1953_v38  ;;  %v974_v61 = vsel %vm942_vm11, %v1971_v44, 0.0  ;;  %v983_v47 = vsel %vm951_vm6, %v1885_v13, 0.0 }
 0x187   :  { %1006 = vadd.xlane.f32.xlu0 %v969_v46  ;;  %v981_v46 = vsel %vm949_vm5, %v1873_v8, 0.0 }
 0x188   :  { %564 = vmax.xlane.f32.xlu1 %v1951_v37 }
 0x18a   :  { %v1984_v49 = vpop.f32.mrb[12].mxu0  ;;  %v1986_v50 = vpop.f32.mrb[12].mxu1 }
 0x18b   :  { %497 = vst [vmem:[#allocation2 + $0x68] sm:$0xff] %v1984_v49  ;;  %513 = vst [vmem:[#allocation2 + $0xe8] sm:$0xff] %v1986_v50  ;;  %v1991_v51 = vpop.f32.mrb[13].mxu1  ;;  %530 = vmax.xlane.f32.xlu0 %v1921_v26  ;;  %v1994_v52 = vpop.f32.mrb[13].mxu0  ;;  %v1998_v54 = vsel %vm961_vm8, %v1986_v50, 0.0  ;;  %v977_v39 = vsel %vm945_vm3, %v1984_v49, 0.0  ;;  %vm955_vm8 = vcmp.eq.s32.totalorder %v1779_v25, %v1919_v24 }
 0x18c   :  { %512 = vst [vmem:[#allocation2 + $0xe0] sm:$0xff] %v1991_v51  ;;  %496 = vst [vmem:[#allocation2 + $0x60] sm:$0xff] %v1994_v52  ;;  %1012 = vadd.xlane.f32.xlu1 %v972_v53  ;;  %v976_v17 = vsel %vm944_vm14, %v1994_v52, 0.0  ;;  %v987_v6 = vsel %vm955_vm8, %v1923_v27, 0.0  ;;  %v2072_v53 = vpop.permute.xlu0 %915  ;;  %vm957_vm14 = vcmp.eq.s32.totalorder %v1779_v25, %v1940_v33 }
 0x18d   :  { %vm958_vm11 = vcmp.eq.s32.totalorder %v1779_v25, %v2072_v53 }
 0x18f   :  { %562 = vmax.xlane.f32.xlu0 %v1923_v27 }
 0x190   :  { %536 = vmax.xlane.f32.xlu1 %v1971_v44  ;;  %v2074_v18 = vpop.permute.xlu0 %921 }
 0x191   :  { %vm960_vm12 = vcmp.eq.s32.totalorder %v1779_v25, %v2074_v18 }
 0x192   :  { %v2006_v56 = vpop.f32.mrb[14].mxu0  ;;  %v2008_v57 = vpop.f32.mrb[14].mxu1 }
 0x193   :  { %499 = vst [vmem:[#allocation2 + $0x78] sm:$0xff] %v2006_v56  ;;  %515 = vst [vmem:[#allocation2 + $0xf8] sm:$0xff] %v2008_v57  ;;  %v2013_v59 = vpop.f32.mrb[15].mxu1  ;;  %1010 = vadd.xlane.f32.xlu0 %v971_v58  ;;  %v2015_v60 = vpop.f32.mrb[15].mxu0  ;;  %v979_v11 = vsel %vm947_vm9, %v2006_v56, 0.0 }
 0x194   :  { %514 = vst [vmem:[#allocation2 + $0xf0] sm:$0xff] %v2013_v59  ;;  %498 = vst [vmem:[#allocation2 + $0x70] sm:$0xff] %v2015_v60  ;;  %568 = vmax.xlane.f32.xlu1 %v1968_v43  ;;  %v978_v40 = vsel %vm946_vm4, %v2015_v60, 0.0  ;;  %v2078_v58 = vpop.permute.xlu0 %927 }
 0x195   :  { %vm962_vm13 = vcmp.eq.s32.totalorder %v1779_v25, %v2078_v58 }
 0x196   :  { %v994_v53 = vsel %vm962_vm13, %v2013_v59, 0.0 }
 0x197   :  { %534 = vmax.xlane.f32.xlu0 %v1944_v34 }
 0x198   :  { %1016 = vadd.xlane.f32.xlu1 %v974_v61 }
 0x19b   :  { %566 = vmax.xlane.f32.xlu0 %v1946_v35 }
 0x19c   :  { %540 = vmax.xlane.f32.xlu1 %v1994_v52 }
 0x19f   :  { %1014 = vadd.xlane.f32.xlu0 %v973_v63 }
 0x1a0   :  { %572 = vmax.xlane.f32.xlu1 %v1991_v51 }
 0x1a3   :  { %538 = vmax.xlane.f32.xlu0 %v1962_v41 }
 0x1a4   :  { %544 = vmax.xlane.f32.xlu1 %v2015_v60 }
 0x1a7   :  { %570 = vmax.xlane.f32.xlu0 %v1964_v42 }
 0x1a8   :  { %576 = vmax.xlane.f32.xlu1 %v2013_v59 }
 0x1ab   :  { %1018 = vadd.xlane.f32.xlu0 %v975_v1 }
 0x1ac   :  { %1020 = vadd.xlane.f32.xlu1 %v976_v17 }
 0x1af   :  { %542 = vmax.xlane.f32.xlu0 %v1984_v49 }
 0x1b0   :  { %1028 = vadd.xlane.f32.xlu1 %v980_v23 }
 0x1b3   :  { %574 = vmax.xlane.f32.xlu0 %v1986_v50 }
 0x1b4   :  { %1032 = vadd.xlane.f32.xlu1 %v982_v2 }
 0x1b7   :  { %546 = vmax.xlane.f32.xlu0 %v2006_v56 }
 0x1b8   :  { %1036 = vadd.xlane.f32.xlu1 %v984_v32 }
 0x1bb   :  { %578 = vmax.xlane.f32.xlu0 %v2008_v57 }
 0x1bc   :  { %1040 = vadd.xlane.f32.xlu1 %v986_v36 }
 0x1bf   :  { %1022 = vadd.xlane.f32.xlu0 %v977_v39 }
 0x1c0   :  { %1024 = vadd.xlane.f32.xlu1 %v978_v40 }
 0x1c3   :  { %1030 = vadd.xlane.f32.xlu0 %v981_v46 }
 0x1c7   :  { %1034 = vadd.xlane.f32.xlu0 %v983_v47 }
 0x1cb   :  { %1038 = vadd.xlane.f32.xlu0 %v985_v3 }
 0x1cf   :  { %1042 = vadd.xlane.f32.xlu0 %v987_v6 }
 0x1d3   :  { %1026 = vadd.xlane.f32.xlu0 %v979_v11 }
 0x1e8   :  { %v2080_v24 = vpop.xlane.xlu1 %518 }
 0x1e9   :  { %v581_v61 = vsub.f32 %v1864_v5, %v2080_v24 }
 0x1eb   :  { %v614_v62 = vmul.f32 1.442695, %v581_v61 }
 0x1ec   :  { %v2084_v4 = vpop.xlane.xlu0 %550 }
 0x1ed   :  { %1360 = vpow2.f32 %v614_v62  ;;  %v597_v63 = vsub.f32 %v1873_v8, %v2084_v4  ;;  %v2088_v0 = vpop.xlane.xlu1 %548 }
 0x1ee   :  { %v596_v16 = vsub.f32 %v1877_v10, %v2088_v0 }
 0x1ef   :  { %v646_v9 = vmul.f32 1.442695, %v597_v63 }
 0x1f0   :  { %v2090_v1 = vpop.xlane.xlu0 %516  ;;  %v644_v2 = vmul.f32 1.442695, %v596_v16 }
 0x1f1   :  { %1362 = vpow2.f32 %v646_v9  ;;  %v580_v17 = vsub.f32 %v1870_v7, %v2090_v1  ;;  %v2096_v5 = vpop.xlane.xlu1 %998 }
 0x1f3   :  { %v612_v23 = vmul.f32 1.442695, %v580_v17 }
 0x1f4   :  { %v2098_v30 = vpop.xlane.xlu0 %996 }
 0x1f5   :  { %1364 = vpow2.f32 %v612_v23  ;;  %v2100_v8 = vpop.xlane.xlu1 %552 }
 0x1f6   :  { %1366 = vpow2.f32 %v644_v2 }
 0x1f7   :  { %v1361_v31 = vpop.eup %1360 }
 0x1f8   :  { %678 = vadd.xlane.f32.xlu0 %v1361_v31  ;;  %v2102_v32 = vpop.xlane.xlu0 %522 }
 0x1f9   :  { %v583_v10 = vsub.f32 %v1883_v12, %v2102_v32  ;;  %v2106_v36 = vpop.xlane.xlu1 %524  ;;  %v598_v12 = vsub.f32 %v1893_v15, %v2100_v8 }
 0x1fa   :  { %v584_v17 = vsub.f32 %v1912_v22, %v2106_v36 }
 0x1fb   :  { %v1363_v7 = vpop.eup %1362  ;;  %v618_v39 = vmul.f32 1.442695, %v583_v10  ;;  %v648_v16 = vmul.f32 1.442695, %v598_v12 }
 0x1fc   :  { %710 = vadd.xlane.f32.xlu0 %v1363_v7  ;;  %v2108_v40 = vpop.xlane.xlu0 %554  ;;  %v620_v31 = vmul.f32 1.442695, %v584_v17 }
 0x1fd   :  { %1368 = vpow2.f32 %v618_v39  ;;  %v599_v46 = vsub.f32 %v1885_v13, %v2108_v40  ;;  %v2112_v47 = vpop.xlane.xlu1 %556 }
 0x1fe   :  { %v600_v15 = vsub.f32 %v1909_v21, %v2112_v47 }
 0x1ff   :  { %v1365_v3 = vpop.eup %1364  ;;  %v650_v6 = vmul.f32 1.442695, %v599_v46 }
 0x200   :  { %676 = vadd.xlane.f32.xlu1 %v1365_v3  ;;  %v2114_v11 = vpop.xlane.xlu0 %520  ;;  %v1367_v63 = vpop.eup %1366  ;;  %v652_v39 = vmul.f32 1.442695, %v600_v15 }
 0x201   :  { %1370 = vpow2.f32 %v650_v6  ;;  %v582_v61 = vsub.f32 %v1891_v14, %v2114_v11  ;;  %v2120_v62 = vpop.xlane.xlu1 %1004 }
 0x203   :  { %v616_v9 = vmul.f32 1.442695, %v582_v61 }
 0x204   :  { %708 = vadd.xlane.f32.xlu1 %v1367_v63  ;;  %v2122_v13 = vpop.xlane.xlu0 %1002 }
 0x205   :  { %1372 = vpow2.f32 %v616_v9  ;;  %v2126_v23 = vpop.xlane.xlu1 %528 }
 0x206   :  { %1374 = vpow2.f32 %v648_v16  ;;  %v586_v46 = vsub.f32 %v1931_v29, %v2126_v23 }
 0x207   :  { %v1369_v2 = vpop.eup %1368  ;;  %1376 = vpow2.f32 %v620_v31 }
 0x208   :  { %682 = vadd.xlane.f32.xlu0 %v1369_v2  ;;  %v2130_v14 = vpop.xlane.xlu0 %1000  ;;  %1378 = vpow2.f32 %v652_v39  ;;  %v624_v61 = vmul.f32 1.442695, %v586_v46 }
 0x209   :  { %v2132_v10 = vpop.xlane.xlu1 %560 }
 0x20a   :  { %v602_v9 = vsub.f32 %v1928_v28, %v2132_v10 }
 0x20b   :  { %v1371_v7 = vpop.eup %1370 }
 0x20c   :  { %714 = vadd.xlane.f32.xlu0 %v1371_v7  ;;  %v2136_v22 = vpop.xlane.xlu0 %526  ;;  %v656_v31 = vmul.f32 1.442695, %v602_v9 }
 0x20d   :  { %v585_v3 = vsub.f32 %v1903_v19, %v2136_v22  ;;  %v2140_v21 = vpop.xlane.xlu1 %1008 }
 0x20f   :  { %v1373_v6 = vpop.eup %1372  ;;  %v622_v12 = vmul.f32 1.442695, %v585_v3 }
 0x210   :  { %680 = vadd.xlane.f32.xlu1 %v1373_v6  ;;  %v2142_v63 = vpop.xlane.xlu0 %558  ;;  %v1375_v17 = vpop.eup %1374 }
 0x211   :  { %1380 = vpow2.f32 %v622_v12  ;;  %v601_v29 = vsub.f32 %v1905_v20, %v2142_v63  ;;  %v2148_v16 = vpop.xlane.xlu1 %532  ;;  %v1377_v28 = vpop.eup %1376 }
 0x212   :  { %1382 = vpow2.f32 %v624_v61  ;;  %v588_v2 = vsub.f32 %v1953_v38, %v2148_v16  ;;  %v1379_v6 = vpop.eup %1378 }
 0x213   :  { %v654_v19 = vmul.f32 1.442695, %v601_v29 }
 0x214   :  { %712 = vadd.xlane.f32.xlu1 %v1375_v17  ;;  %v2152_v15 = vpop.xlane.xlu0 %1006  ;;  %v628_v39 = vmul.f32 1.442695, %v588_v2 }
 0x215   :  { %1384 = vpow2.f32 %v654_v19  ;;  %v2154_v7 = vpop.xlane.xlu1 %564 }
 0x216   :  { %2480 = vst [vmem:[#allocation5_spill] sm:$0xff] %v2154_v7  ;;  %v604_v20 = vsub.f32 %v1951_v37, %v2154_v7  ;;  %1386 = vpow2.f32 %v656_v31 }
 0x217   :  { %1388 = vpow2.f32 %v628_v39 }
 0x218   :  { %684 = vadd.xlane.f32.xlu1 %v1377_v28  ;;  %v2158_v46 = vpop.xlane.xlu0 %530  ;;  %v660_v9 = vmul.f32 1.442695, %v604_v20 }
 0x219   :  { %v587_v3 = vsub.f32 %v1921_v26, %v2158_v46  ;;  %v2162_v38 = vpop.xlane.xlu1 %1012 }
 0x21b   :  { %v1381_v12 = vpop.eup %1380  ;;  %v626_v61 = vmul.f32 1.442695, %v587_v3 }
 0x21c   :  { %716 = vadd.xlane.f32.xlu1 %v1379_v6  ;;  %686 = vadd.xlane.f32.xlu0 %v1381_v12  ;;  %v2164_v29 = vpop.xlane.xlu0 %562  ;;  %v1383_v2 = vpop.eup %1382 }
 0x21d   :  { %1390 = vpow2.f32 %v626_v61  ;;  %v603_v17 = vsub.f32 %v1923_v27, %v2164_v29  ;;  %v2168_v19 = vpop.xlane.xlu1 %536 }
 0x21e   :  { %v590_v26 = vsub.f32 %v1971_v44, %v2168_v19  ;;  %1392 = vpow2.f32 %v660_v9 }
 0x21f   :  { %v1385_v31 = vpop.eup %1384  ;;  %v658_v28 = vmul.f32 1.442695, %v603_v17 }
 0x220   :  { %688 = vadd.xlane.f32.xlu1 %v1383_v2  ;;  %718 = vadd.xlane.f32.xlu0 %v1385_v31  ;;  %v2172_v39 = vpop.xlane.xlu0 %1010  ;;  %v632_v20 = vmul.f32 1.442695, %v590_v26  ;;  %v1387_v6 = vpop.eup %1386 }
 0x221   :  { %1394 = vpow2.f32 %v658_v28  ;;  %v2174_v3 = vpop.xlane.xlu1 %568  ;;  %v1389_v17 = vpop.eup %1388 }
 0x222   :  { %2481 = vst [vmem:[#allocation6_spill] sm:$0xff] %v2174_v3  ;;  %v606_v27 = vsub.f32 %v1968_v43, %v2174_v3  ;;  %1396 = vpow2.f32 %v632_v20 }
 0x224   :  { %v664_v12 = vmul.f32 1.442695, %v606_v27  ;;  %720 = vadd.xlane.f32.xlu1 %v1387_v6  ;;  %v2178_v61 = vpop.xlane.xlu0 %534 }
 0x225   :  { %v589_v44 = vsub.f32 %v1944_v34, %v2178_v61  ;;  %v2182_v9 = vpop.xlane.xlu1 %1016 }
 0x226   :  { %1398 = vpow2.f32 %v664_v12 }
 0x227   :  { %v1391_v2 = vpop.eup %1390  ;;  %v630_v31 = vmul.f32 1.442695, %v589_v44 }
 0x228   :  { %692 = vadd.xlane.f32.xlu1 %v1389_v17  ;;  %690 = vadd.xlane.f32.xlu0 %v1391_v2  ;;  %v2184_v26 = vpop.xlane.xlu0 %566  ;;  %v1393_v20 = vpop.eup %1392 }
 0x229   :  { %2482 = vst [vmem:[#allocation7_spill] sm:$0xff] %v2184_v26  ;;  %1400 = vpow2.f32 %v630_v31  ;;  %v605_v28 = vsub.f32 %v1946_v35, %v2184_v26  ;;  %v2188_v27 = vpop.xlane.xlu1 %540 }
 0x22a   :  { %v592_v34 = vsub.f32 %v1994_v52, %v2188_v27 }
 0x22b   :  { %v1395_v6 = vpop.eup %1394  ;;  %v662_v3 = vmul.f32 1.442695, %v605_v28 }
 0x22c   :  { %v636_v7 = vmul.f32 1.442695, %v592_v34  ;;  %724 = vadd.xlane.f32.xlu1 %v1393_v20  ;;  %722 = vadd.xlane.f32.xlu0 %v1395_v6  ;;  %v2192_v12 = vpop.xlane.xlu0 %1014  ;;  %v1397_v2 = vpop.eup %1396 }
 0x22d   :  { %1402 = vpow2.f32 %v662_v3  ;;  %v2194_v44 = vpop.xlane.xlu1 %572 }
 0x22e   :  { %2483 = vst [vmem:[#allocation8_spill] sm:$0xff] %v2194_v44  ;;  %1404 = vpow2.f32 %v636_v7  ;;  %v608_v17 = vsub.f32 %v1991_v51, %v2194_v44 }
 0x230   :  { %v668_v31 = vmul.f32 1.442695, %v608_v17  ;;  %696 = vadd.xlane.f32.xlu1 %v1397_v2  ;;  %v2198_v26 = vpop.xlane.xlu0 %538  ;;  %v1399_v20 = vpop.eup %1398 }
 0x231   :  { %2484 = vst [vmem:[#allocation9_spill] sm:$0xff] %v2198_v26  ;;  %v591_v52 = vsub.f32 %v1962_v41, %v2198_v26  ;;  %v2202_v28 = vpop.xlane.xlu1 %544 }
 0x232   :  { %2485 = vst [vmem:[#allocation10_spill] sm:$0xff] %v2202_v28  ;;  %1406 = vpow2.f32 %v668_v31  ;;  %v594_v3 = vsub.f32 %v2015_v60, %v2202_v28 }
 0x233   :  { %v1401_v34 = vpop.eup %1400  ;;  %v634_v7 = vmul.f32 1.442695, %v591_v52 }
 0x234   :  { %v640_v6 = vmul.f32 1.442695, %v594_v3  ;;  %728 = vadd.xlane.f32.xlu1 %v1399_v20  ;;  %694 = vadd.xlane.f32.xlu0 %v1401_v34  ;;  %v2206_v44 = vpop.xlane.xlu0 %570 }
 0x235   :  { %1408 = vpow2.f32 %v634_v7  ;;  %v607_v17 = vsub.f32 %v1964_v42, %v2206_v44  ;;  %v2210_v2 = vpop.xlane.xlu1 %576 }
 0x236   :  { %1410 = vpow2.f32 %v640_v6  ;;  %v610_v41 = vsub.f32 %v2013_v59, %v2210_v2  ;;  %v995_v59 = vsel %vm963_vm15, %v2008_v57, 0.0 }
 0x237   :  { %v1403_v31 = vpop.eup %1402  ;;  %v666_v26 = vmul.f32 1.442695, %v607_v17 }
 0x238   :  { %v1405_v60 = vpop.eup %1404  ;;  %v672_v28 = vmul.f32 1.442695, %v610_v41  ;;  %726 = vadd.xlane.f32.xlu0 %v1403_v31  ;;  %v2214_v52 = vpop.xlane.xlu0 %1018 }
 0x239   :  { %1412 = vpow2.f32 %v666_v26  ;;  %700 = vadd.xlane.f32.xlu1 %v1405_v60  ;;  %v2254_v58 = vpop.xlane.xlu1 %1020 }
 0x23a   :  { %1414 = vpow2.f32 %v672_v28 }
 0x23c   :  { %v1407_v20 = vpop.eup %1406  ;;  %v2216_v3 = vpop.xlane.xlu0 %542 }
 0x23d   :  { %v593_v42 = vsub.f32 %v1984_v49, %v2216_v3  ;;  %732 = vadd.xlane.f32.xlu1 %v1407_v20  ;;  %v2258_v33 = vpop.xlane.xlu1 %1028 }
 0x23f   :  { %v1409_v34 = vpop.eup %1408  ;;  %v638_v7 = vmul.f32 1.442695, %v593_v42 }
 0x240   :  { %v1411_v6 = vpop.eup %1410  ;;  %698 = vadd.xlane.f32.xlu0 %v1409_v34  ;;  %v2220_v17 = vpop.xlane.xlu0 %574 }
 0x241   :  { %1416 = vpow2.f32 %v638_v7  ;;  %v609_v41 = vsub.f32 %v1986_v50, %v2220_v17  ;;  %704 = vadd.xlane.f32.xlu1 %v1411_v6  ;;  %v988_v50 = vsel %vm956_vm10, %v1951_v37, 0.0  ;;  %v992_v37 = vsel %vm960_vm12, %v1991_v51, 0.0 }
 0x243   :  { %v1413_v26 = vpop.eup %1412  ;;  %v670_v28 = vmul.f32 1.442695, %v609_v41 }
 0x244   :  { %v1415_v31 = vpop.eup %1414  ;;  %730 = vadd.xlane.f32.xlu0 %v1413_v26  ;;  %v2224_v60 = vpop.xlane.xlu0 %546 }
 0x245   :  { %1418 = vpow2.f32 %v670_v28  ;;  %v595_v49 = vsub.f32 %v2006_v56, %v2224_v60  ;;  %736 = vadd.xlane.f32.xlu1 %v1415_v31  ;;  %v990_v56 = vsel %vm958_vm11, %v1968_v43, 0.0  ;;  %v989_v43 = vsel %vm957_vm14, %v1946_v35, 0.0 }
 0x247   :  { %v642_v20 = vmul.f32 1.442695, %v595_v49 }
 0x248   :  { %v2230_v42 = vpop.xlane.xlu0 %578 }
 0x249   :  { %1420 = vpow2.f32 %v642_v20  ;;  %v611_v34 = vsub.f32 %v2008_v57, %v2230_v42  ;;  %1044 = vadd.xlane.f32.xlu1 %v988_v50 }
 0x24b   :  { %v1417_v7 = vpop.eup %1416  ;;  %v674_v6 = vmul.f32 1.442695, %v611_v34 }
 0x24c   :  { %702 = vadd.xlane.f32.xlu0 %v1417_v7  ;;  %v2248_v51 = vpop.xlane.xlu0 %1022 }
 0x24d   :  { %1422 = vpow2.f32 %v674_v6  ;;  %1048 = vadd.xlane.f32.xlu1 %v990_v56 }
 0x24f   :  { %v1419_v48 = vpop.eup %1418 }
 0x250   :  { %734 = vadd.xlane.f32.xlu0 %v1419_v48  ;;  %v1031_v18 = vpop.xlane.xlu0 %1030 }
 0x251   :  { %1052 = vadd.xlane.f32.xlu1 %v992_v37 }
 0x253   :  { %v1421_v41 = vpop.eup %1420 }
 0x254   :  { %706 = vadd.xlane.f32.xlu0 %v1421_v41  ;;  %v2256_v28 = vpop.xlane.xlu0 %1034 }
 0x255   :  { %1056 = vadd.xlane.f32.xlu1 %v994_v53 }
 0x257   :  { %v1423_v26 = vpop.eup %1422 }
 0x258   :  { %738 = vadd.xlane.f32.xlu0 %v1423_v26  ;;  %v2260_v35 = vpop.xlane.xlu0 %1038 }
 0x25c   :  { %1046 = vadd.xlane.f32.xlu0 %v989_v43 }
 0x260   :  { %1050 = vadd.xlane.f32.xlu0 %v1974_v45  ;;  %v2262_v45 = vpop.xlane.xlu1 %1032 }
 0x264   :  { %1054 = vadd.xlane.f32.xlu0 %v1998_v54 }
 0x268   :  { %1058 = vadd.xlane.f32.xlu0 %v995_v59 }
 0x269   :  { %1499 = shalt.err (!%p1496_p4)
}
 0x26a   :  { %s1500_s2 = scalar_lea.hbm %s2472_s3, 4096 }
 0x26b   :  { %p1501_p5 = scmp.ne.s32.totalorder %s2472_s3, %s1500_s2  ;;  %p1504_p6 = scmp.lt.u32.totalorder %s1500_s2, %s2472_s3 }
 0x26d   :  { %p1506_p7 = pnand %p1504_p6, %p1501_p5 }
 0x26f   :  { %1509 = shalt.err (!%p1506_p7)
}
 0x270   :  { %s1515_s21 = smov 128   ;;  %s1516_s22 = smov 8   ;;  %v2276_v25 = vpop.xlane.xlu0 %1042  ;;  %v2278_v54 = vpop.xlane.xlu1 %1036  ;;  %vm1092_vm0 = vcmask 7168  }
 0x271   :  { %1136 = dma.vmem_to_hbm [thread:$0]  %s1131_s0, 4096, %s2472_s3, [#allocation3], %s1515_s21, %s1515_s21, %s1516_s22  }
 0x274   :  { %v2280_v57 = vpop.xlane.xlu0 %1026  ;;  %v2282_v55 = vpop.xlane.xlu1 %1040 }
 0x278   :  { %v2284_v49 = vpop.xlane.xlu1 %1024 }
 0x285   :  { %v679_v31 = vpop.xlane.xlu0 %678 }
 0x286   :  { %1424 = vlog2.f32 %v679_v31 }
 0x289   :  { %v711_v20 = vpop.xlane.xlu0 %710 }
 0x28a   :  { %1426 = vlog2.f32 %v711_v20 }
 0x28d   :  { %v677_v50 = vpop.xlane.xlu1 %676 }
 0x28e   :  { %1428 = vlog2.f32 %v677_v50 }
 0x290   :  { %v1425_v34 = vpop.eup %1424 }
 0x291   :  { %v743_v7 = vmul.f32 0.6931472, %v1425_v34  ;;  %v709_v6 = vpop.xlane.xlu1 %708 }
 0x292   :  { %1430 = vlog2.f32 %v709_v6 }
 0x293   :  { %v805_v56 = vadd.f32 %v743_v7, %v2080_v24 }
 0x294   :  { %v1427_v48 = vpop.eup %1426 }
 0x295   :  { %v1061_v37 = vsub.f32 %v805_v56, %v2096_v5  ;;  %v775_v41 = vmul.f32 0.6931472, %v1427_v48  ;;  %v683_v53 = vpop.xlane.xlu0 %682 }
 0x296   :  { %1432 = vlog2.f32 %v683_v53 }
 0x297   :  { %1094 = vst.msk [vmem:[%s2473_s4 + $0x8] sm:$0xff] %vm1092_vm0, %v1061_v37  ;;  %v821_v26 = vadd.f32 %v775_v41, %v2084_v4 }
 0x298   :  { %v1429_v43 = vpop.eup %1428 }
 0x299   :  { %v1077_v59 = vsub.f32 %v821_v26, %v1031_v18  ;;  %v741_v31 = vmul.f32 0.6931472, %v1429_v43  ;;  %v715_v20 = vpop.xlane.xlu0 %714 }
 0x29a   :  { %1434 = vlog2.f32 %v715_v20 }
 0x29b   :  { %1110 = vst.msk [vmem:[%s2473_s4 + $0x88] sm:$0xff] %vm1092_vm0, %v1077_v59  ;;  %v804_v24 = vadd.f32 %v741_v31, %v2090_v1 }
 0x29c   :  { %v1431_v5 = vpop.eup %1430 }
 0x29d   :  { %v1060_v50 = vsub.f32 %v804_v24, %v2098_v30  ;;  %v773_v34 = vmul.f32 0.6931472, %v1431_v5  ;;  %v681_v7 = vpop.xlane.xlu1 %680 }
 0x29e   :  { %1436 = vlog2.f32 %v681_v7 }
 0x29f   :  { %1093 = vst.msk [vmem:[%s2473_s4] sm:$0xff] %vm1092_vm0, %v1060_v50  ;;  %v820_v4 = vadd.f32 %v773_v34, %v2088_v0 }
 0x2a0   :  { %v1433_v18 = vpop.eup %1432 }
 0x2a1   :  { %v1076_v6 = vsub.f32 %v820_v4, %v2258_v33  ;;  %v747_v56 = vmul.f32 0.6931472, %v1433_v18  ;;  %v713_v48 = vpop.xlane.xlu1 %712 }
 0x2a2   :  { %1438 = vlog2.f32 %v713_v48 }
 0x2a3   :  { %1109 = vst.msk [vmem:[%s2473_s4 + $0x80] sm:$0xff] %vm1092_vm0, %v1076_v6  ;;  %v807_v1 = vadd.f32 %v747_v56, %v2102_v32 }
 0x2a4   :  { %v1435_v30 = vpop.eup %1434 }
 0x2a5   :  { %v1063_v37 = vsub.f32 %v807_v1, %v2122_v13  ;;  %v779_v41 = vmul.f32 0.6931472, %v1435_v30  ;;  %v685_v53 = vpop.xlane.xlu1 %684 }
 0x2a6   :  { %1440 = vlog2.f32 %v685_v53 }
 0x2a7   :  { %1096 = vst.msk [vmem:[%s2473_s4 + $0x18] sm:$0xff] %vm1092_vm0, %v1063_v37  ;;  %v823_v0 = vadd.f32 %v779_v41, %v2108_v40 }
 0x2a8   :  { %v1437_v33 = vpop.eup %1436 }
 0x2a9   :  { %v1079_v26 = vsub.f32 %v823_v0, %v2256_v28  ;;  %v745_v43 = vmul.f32 0.6931472, %v1437_v33  ;;  %v717_v59 = vpop.xlane.xlu1 %716  ;;  %v687_v31 = vpop.xlane.xlu0 %686 }
 0x2aa   :  { %1442 = vlog2.f32 %v717_v59 }
 0x2ab   :  { %1112 = vst.msk [vmem:[%s2473_s4 + $0x98] sm:$0xff] %vm1092_vm0, %v1079_v26  ;;  %v806_v32 = vadd.f32 %v745_v43, %v2114_v11  ;;  %1444 = vlog2.f32 %v687_v31 }
 0x2ac   :  { %v1439_v13 = vpop.eup %1438 }
 0x2ad   :  { %v1062_v20 = vsub.f32 %v806_v32, %v2130_v14  ;;  %v777_v24 = vmul.f32 0.6931472, %v1439_v13  ;;  %v689_v40 = vpop.xlane.xlu1 %688  ;;  %v719_v5 = vpop.xlane.xlu0 %718 }
 0x2ae   :  { %1446 = vlog2.f32 %v689_v40 }
 0x2af   :  { %1095 = vst.msk [vmem:[%s2473_s4 + $0x10] sm:$0xff] %vm1092_vm0, %v1062_v20  ;;  %v822_v28 = vadd.f32 %v777_v24, %v2100_v8  ;;  %1448 = vlog2.f32 %v719_v5 }
 0x2b0   :  { %v1441_v50 = vpop.eup %1440 }
 0x2b1   :  { %v1078_v34 = vsub.f32 %v822_v28, %v2262_v45  ;;  %v749_v11 = vmul.f32 0.6931472, %v1441_v50  ;;  %v721_v7 = vpop.xlane.xlu1 %720 }
 0x2b2   :  { %1450 = vlog2.f32 %v721_v7 }
 0x2b3   :  { %1111 = vst.msk [vmem:[%s2473_s4 + $0x90] sm:$0xff] %vm1092_vm0, %v1078_v34  ;;  %v808_v14 = vadd.f32 %v749_v11, %v2106_v36 }
 0x2b4   :  { %v1443_v4 = vpop.eup %1442 }
 0x2b5   :  { %v1445_v18 = vpop.eup %1444  ;;  %v1064_v6 = vsub.f32 %v808_v14, %v2120_v62  ;;  %v781_v56 = vmul.f32 0.6931472, %v1443_v4  ;;  %v693_v8 = vpop.xlane.xlu1 %692 }
 0x2b6   :  { %v691_v48 = vpop.xlane.xlu0 %690  ;;  %v751_v1 = vmul.f32 0.6931472, %v1445_v18  ;;  %1452 = vlog2.f32 %v693_v8 }
 0x2b7   :  { %1097 = vst.msk [vmem:[%s2473_s4 + $0x20] sm:$0xff] %vm1092_vm0, %v1064_v6  ;;  %v824_v45 = vadd.f32 %v781_v56, %v2112_v47  ;;  %1454 = vlog2.f32 %v691_v48 }
 0x2b8   :  { %v1447_v30 = vpop.eup %1446  ;;  %v809_v36 = vadd.f32 %v751_v1, %v2136_v22 }
 0x2b9   :  { %v1449_v37 = vpop.eup %1448  ;;  %v1080_v41 = vsub.f32 %v824_v45, %v2278_v54  ;;  %v753_v62 = vmul.f32 0.6931472, %v1447_v30  ;;  %v725_v53 = vpop.xlane.xlu1 %724 }
 0x2ba   :  { %v723_v0 = vpop.xlane.xlu0 %722  ;;  %v1065_v33 = vsub.f32 %v809_v36, %v2152_v15  ;;  %v783_v26 = vmul.f32 0.6931472, %v1449_v37 }
 0x2bb   :  { %1113 = vst.msk [vmem:[%s2473_s4 + $0xa0] sm:$0xff] %vm1092_vm0, %v1080_v41  ;;  %v810_v47 = vadd.f32 %v753_v62, %v2126_v23  ;;  %1456 = vlog2.f32 %v723_v0  ;;  %v2486_v62 = vld [vmem:[#allocation5_spill] sm:$0xff] }
 0x2bc   :  { %v1451_v43 = vpop.eup %1450  ;;  %1098 = vst.msk [vmem:[%s2473_s4 + $0x28] sm:$0xff] %vm1092_vm0, %v1065_v33  ;;  %v825_v22 = vadd.f32 %v783_v26, %v2142_v63 }
 0x2bd   :  { %v1066_v54 = vsub.f32 %v810_v47, %v2140_v21  ;;  %v785_v15 = vmul.f32 0.6931472, %v1451_v43  ;;  %v697_v59 = vpop.xlane.xlu1 %696 }
 0x2be   :  { %v1081_v31 = vsub.f32 %v825_v22, %v2260_v35  ;;  %1458 = vlog2.f32 %v697_v59 }
 0x2bf   :  { %1099 = vst.msk [vmem:[%s2473_s4 + $0x30] sm:$0xff] %vm1092_vm0, %v1066_v54  ;;  %v826_v23 = vadd.f32 %v785_v15, %v2132_v10  ;;  %v2487_v54 = vld [vmem:[#allocation6_spill] sm:$0xff] }
 0x2c0   :  { %v1453_v32 = vpop.eup %1452  ;;  %1114 = vst.msk [vmem:[%s2473_s4 + $0xa8] sm:$0xff] %vm1092_vm0, %v1081_v31  ;;  %v2488_v31 = vld [vmem:[#allocation9_spill] sm:$0xff] }
 0x2c1   :  { %v1455_v63 = vpop.eup %1454  ;;  %v1082_v21 = vsub.f32 %v826_v23, %v2282_v55  ;;  %v757_v13 = vmul.f32 0.6931472, %v1453_v32  ;;  %v729_v20 = vpop.xlane.xlu1 %728 }
 0x2c2   :  { %v695_v35 = vpop.xlane.xlu0 %694  ;;  %v755_v24 = vmul.f32 0.6931472, %v1455_v63  ;;  %v2489_v63 = vld [vmem:[#allocation10_spill] sm:$0xff] }
 0x2c3   :  { %1115 = vst.msk [vmem:[%s2473_s4 + $0xb0] sm:$0xff] %vm1092_vm0, %v1082_v21  ;;  %v812_v10 = vadd.f32 %v757_v13, %v2148_v16  ;;  %1460 = vlog2.f32 %v695_v35 }
 0x2c4   :  { %v811_v40 = vadd.f32 %v755_v24, %v2158_v46  ;;  %1462 = vlog2.f32 %v725_v53  ;;  %v2490_v24 = vld [vmem:[#allocation8_spill] sm:$0xff] }
 0x2c5   :  { %v1457_v5 = vpop.eup %1456  ;;  %v1068_v28 = vsub.f32 %v812_v10, %v2162_v38 }
 0x2c6   :  { %v1067_v55 = vsub.f32 %v811_v40, %v2172_v39  ;;  %v787_v50 = vmul.f32 0.6931472, %v1457_v5  ;;  %v701_v34 = vpop.xlane.xlu1 %700  ;;  %v727_v38 = vpop.xlane.xlu0 %726 }
 0x2c7   :  { %1101 = vst.msk [vmem:[%s2473_s4 + $0x40] sm:$0xff] %vm1092_vm0, %v1068_v28  ;;  %1464 = vlog2.f32 %v701_v34 }
 0x2c8   :  { %v1459_v11 = vpop.eup %1458  ;;  %1100 = vst.msk [vmem:[%s2473_s4 + $0x38] sm:$0xff] %vm1092_vm0, %v1067_v55  ;;  %v827_v16 = vadd.f32 %v787_v50, %v2164_v29  ;;  %1466 = vlog2.f32 %v729_v20 }
 0x2c9   :  { %v761_v46 = vmul.f32 0.6931472, %v1459_v11 }
 0x2ca   :  { %v1083_v39 = vsub.f32 %v827_v16, %v2276_v25  ;;  %v733_v7 = vpop.xlane.xlu1 %732 }
 0x2cb   :  { %v814_v14 = vadd.f32 %v761_v46, %v2168_v19  ;;  %1468 = vlog2.f32 %v733_v7 }
 0x2cc   :  { %1116 = vst.msk [vmem:[%s2473_s4 + $0xb8] sm:$0xff] %vm1092_vm0, %v1083_v39 }
 0x2cd   :  { %v1461_v4 = vpop.eup %1460  ;;  %v1070_v18 = vsub.f32 %v814_v14, %v2182_v9  ;;  %v699_v6 = vpop.xlane.xlu0 %698 }
 0x2ce   :  { %v1463_v56 = vpop.eup %1462  ;;  %v759_v29 = vmul.f32 0.6931472, %v1461_v4  ;;  %1470 = vlog2.f32 %v699_v6  ;;  %v705_v8 = vpop.xlane.xlu1 %704  ;;  %v2491_v4 = vld [vmem:[#allocation7_spill] sm:$0xff] }
 0x2cf   :  { %1103 = vst.msk [vmem:[%s2473_s4 + $0x50] sm:$0xff] %vm1092_vm0, %v1070_v18  ;;  %1472 = vlog2.f32 %v705_v8  ;;  %v789_v48 = vmul.f32 0.6931472, %v1463_v56 }
 0x2d0   :  { %v813_v19 = vadd.f32 %v759_v29, %v2178_v61 }
 0x2d1   :  { %v1465_v25 = vpop.eup %1464  ;;  %v731_v41 = vpop.xlane.xlu0 %730  ;;  %v828_v53 = vadd.f32 %v789_v48, %v2486_v62 }
 0x2d2   :  { %v1467_v1 = vpop.eup %1466  ;;  %v1069_v45 = vsub.f32 %v813_v19, %v2192_v12  ;;  %v765_v30 = vmul.f32 0.6931472, %v1465_v25  ;;  %v737_v9 = vpop.xlane.xlu1 %736 }
 0x2d3   :  { %1474 = vlog2.f32 %v737_v9  ;;  %v793_v37 = vmul.f32 0.6931472, %v1467_v1 }
 0x2d4   :  { %1102 = vst.msk [vmem:[%s2473_s4 + $0x48] sm:$0xff] %vm1092_vm0, %v1069_v45  ;;  %v816_v36 = vadd.f32 %v765_v30, %v2188_v27  ;;  %1476 = vlog2.f32 %v727_v38 }
 0x2d5   :  { %v1469_v61 = vpop.eup %1468 }
 0x2d6   :  { %v1072_v0 = vsub.f32 %v816_v36, %v2254_v58  ;;  %v1045_v33 = vpop.xlane.xlu1 %1044  ;;  %v797_v43 = vmul.f32 0.6931472, %v1469_v61  ;;  %v830_v58 = vadd.f32 %v793_v37, %v2487_v54 }
 0x2d7   :  { %v1084_v12 = vsub.f32 %v828_v53, %v1045_v33 }
 0x2d8   :  { %v1471_v26 = vpop.eup %1470  ;;  %1105 = vst.msk [vmem:[%s2473_s4 + $0x60] sm:$0xff] %vm1092_vm0, %v1072_v0  ;;  %v832_v10 = vadd.f32 %v797_v43, %v2490_v24 }
 0x2d9   :  { %v1473_v47 = vpop.eup %1472  ;;  %v763_v22 = vmul.f32 0.6931472, %v1471_v26  ;;  %1117 = vst.msk [vmem:[%s2473_s4 + $0xc0] sm:$0xff] %vm1092_vm0, %v1084_v12  ;;  %v703_v27 = vpop.xlane.xlu0 %702 }
 0x2da   :  { %v769_v15 = vmul.f32 0.6931472, %v1473_v47  ;;  %1478 = vlog2.f32 %v703_v27  ;;  %v1049_v59 = vpop.xlane.xlu1 %1048 }
 0x2db   :  { %v815_v23 = vadd.f32 %v763_v22, %v2488_v31  ;;  %1480 = vlog2.f32 %v731_v41  ;;  %v1086_v32 = vsub.f32 %v830_v58, %v1049_v59 }
 0x2dc   :  { %v818_v21 = vadd.f32 %v769_v15, %v2489_v63 }
 0x2dd   :  { %v1475_v13 = vpop.eup %1474  ;;  %v1071_v20 = vsub.f32 %v815_v23, %v2214_v52  ;;  %1119 = vst.msk [vmem:[%s2473_s4 + $0xd0] sm:$0xff] %vm1092_vm0, %v1086_v32  ;;  %v735_v35 = vpop.xlane.xlu0 %734 }
 0x2de   :  { %v1074_v40 = vsub.f32 %v818_v21, %v2284_v49  ;;  %v801_v5 = vmul.f32 0.6931472, %v1475_v13  ;;  %v1053_v28 = vpop.xlane.xlu1 %1052  ;;  %1482 = vlog2.f32 %v735_v35  ;;  %v1477_v50 = vpop.eup %1476 }
 0x2df   :  { %1104 = vst.msk [vmem:[%s2473_s4 + $0x58] sm:$0xff] %vm1092_vm0, %v1071_v20  ;;  %v1088_v55 = vsub.f32 %v832_v10, %v1053_v28  ;;  %v791_v46 = vmul.f32 0.6931472, %v1477_v50 }
 0x2e0   :  { %1107 = vst.msk [vmem:[%s2473_s4 + $0x70] sm:$0xff] %vm1092_vm0, %v1074_v40  ;;  %v834_v52 = vadd.f32 %v801_v5, %v2210_v2 }
 0x2e1   :  { %1121 = vst.msk [vmem:[%s2473_s4 + $0xe0] sm:$0xff] %vm1092_vm0, %v1088_v55  ;;  %v707_v49 = vpop.xlane.xlu0 %706  ;;  %v829_v18 = vadd.f32 %v791_v46, %v2491_v4 }
 0x2e2   :  { %1484 = vlog2.f32 %v707_v49  ;;  %v1057_v34 = vpop.xlane.xlu1 %1056 }
 0x2e3   :  { %v1090_v11 = vsub.f32 %v834_v52, %v1057_v34 }
 0x2e4   :  { %v1479_v16 = vpop.eup %1478 }
 0x2e5   :  { %v1481_v38 = vpop.eup %1480  ;;  %v767_v39 = vmul.f32 0.6931472, %v1479_v16  ;;  %1123 = vst.msk [vmem:[%s2473_s4 + $0xf0] sm:$0xff] %vm1092_vm0, %v1090_v11  ;;  %v739_v2 = vpop.xlane.xlu0 %738 }
 0x2e6   :  { %1486 = vlog2.f32 %v739_v2  ;;  %v795_v14 = vmul.f32 0.6931472, %v1481_v38 }
 0x2e7   :  { %v817_v7 = vadd.f32 %v767_v39, %v2216_v3 }
 0x2e8   :  { %v1483_v6 = vpop.eup %1482  ;;  %v831_v3 = vadd.f32 %v795_v14, %v2206_v44 }
 0x2e9   :  { %v1073_v56 = vsub.f32 %v817_v7, %v2248_v51  ;;  %v1047_v29 = vpop.xlane.xlu0 %1046  ;;  %v799_v25 = vmul.f32 0.6931472, %v1483_v6 }
 0x2ea   :  { %v1085_v8 = vsub.f32 %v829_v18, %v1047_v29 }
 0x2eb   :  { %1106 = vst.msk [vmem:[%s2473_s4 + $0x68] sm:$0xff] %vm1092_vm0, %v1073_v56  ;;  %v833_v9 = vadd.f32 %v799_v25, %v2220_v17 }
 0x2ec   :  { %v1485_v19 = vpop.eup %1484  ;;  %1118 = vst.msk [vmem:[%s2473_s4 + $0xc8] sm:$0xff] %vm1092_vm0, %v1085_v8 }
 0x2ed   :  { %v771_v48 = vmul.f32 0.6931472, %v1485_v19  ;;  %v1051_v1 = vpop.xlane.xlu0 %1050 }
 0x2ee   :  { %v1087_v45 = vsub.f32 %v831_v3, %v1051_v1 }
 0x2ef   :  { %v819_v51 = vadd.f32 %v771_v48, %v2224_v60 }
 0x2f0   :  { %v1487_v30 = vpop.eup %1486  ;;  %1120 = vst.msk [vmem:[%s2473_s4 + $0xd8] sm:$0xff] %vm1092_vm0, %v1087_v45 }
 0x2f1   :  { %v1075_v36 = vsub.f32 %v819_v51, %v2280_v57  ;;  %v803_v37 = vmul.f32 0.6931472, %v1487_v30  ;;  %v1055_v41 = vpop.xlane.xlu0 %1054 }
 0x2f2   :  { %v1089_v62 = vsub.f32 %v833_v9, %v1055_v41 }
 0x2f3   :  { %1108 = vst.msk [vmem:[%s2473_s4 + $0x78] sm:$0xff] %vm1092_vm0, %v1075_v36  ;;  %v835_v44 = vadd.f32 %v803_v37, %v2230_v42 }
 0x2f4   :  { %1122 = vst.msk [vmem:[%s2473_s4 + $0xe8] sm:$0xff] %vm1092_vm0, %v1089_v62 }
 0x2f5   :  { %v1059_v60 = vpop.xlane.xlu0 %1058 }
 0x2f6   :  { %v1091_v53 = vsub.f32 %v835_v44, %v1059_v60 }
 0x2f8   :  { %1124 = vst.msk [vmem:[%s2473_s4 + $0xf8] sm:$0xff] %vm1092_vm0, %v1091_v53 }
 0x2f9   :  { %1510 = dma.done.wait [#allocation3], 4096  }
 0x2fa   :  { %1511 = vsyncadd [#allocation3], 4294963200 }
 0x2fb   :  { %1144 = vsyncpa [#allocation3], 1 }

</bundles_post_ra>
